<compile_context>
chip_gen: v5e
topology: v5e:2x2
jax: 0.10.0
libtpu: 0.0.40
codegen_flags: <defaults>
</compile_context>

<pallas_src>
import math
from functools import partial

import jax
import jax.numpy as jnp
from jax.experimental import pallas as pl
from jax.experimental.pallas import tpu as pltpu

# NOTE(v6e/v7x): at real model dims keep D, dh, F multiples of 128 so the MXU contraction
# depth and output lanes are not wasted; this toy config is launch/DMA-latency bound.
CONFIG = {
    "vocab_size": 64,
    "context_length": 16,
    "embedding_dim": 32,
    "num_heads": 4,
    "nb_layers": 2,
    "pad_token": 0,
    "mlp_ratio": 4,
    "ln_eps": 1e-5,
}

NEG_INF = -1e9


def _layernorm_f32(x, gamma, beta, eps):
    # Single-pass statistics: E[x], E[x^2]; var = E[x^2] - E[x]^2.
    # (Two independent XLU reduces instead of a serial mean -> centered-mean chain.)
    mu = jnp.mean(x, axis=-1, keepdims=True)
    ms = jnp.mean(x * x, axis=-1, keepdims=True)
    var = ms - mu * mu
    return (x - mu) * jax.lax.rsqrt(var + eps) * gamma + beta


# ---------------------------------------------------------------------------
# Fused kernel: grid = (batch_block, layer).  Activations for one batch block stay
# resident in o_ref across all layers.
# ---------------------------------------------------------------------------
def _gpt_fused_kernel(num_heads, ln_eps,
                      x0_ref, keyok_ref,
                      g1_ref, be1_ref, wqkv_ref, bqkv_ref, wo_ref, bo_ref,
                      g2_ref, be2_ref, w1_ref, b1_ref, w2_ref, b2_ref,
                      o_ref):
    l = pl.program_id(1)

    # Seed the resident activation carry at layer 0 (token+pos add done in XLA wrapper).
    @pl.when(l == 0)
    def _():
        o_ref[...] = x0_ref[...]

    x = o_ref[...]                       # (S, D) f32 residual stream for this batch block
    S, D = x.shape
    H = num_heads

    # ---- causal + key-padding mask, built in-kernel (O(S^2) VPU compares; no HBM bias).
    #      Batch isolation is free: each grid block is a single batch. ----
    row = jax.lax.broadcasted_iota(jnp.int32, (S, S), 0)
    col = jax.lax.broadcasted_iota(jnp.int32, (S, S), 1)
    key_ok = keyok_ref[...] > 0.5                              # (1, S), broadcast over rows
    bias = jnp.where((col <= row) & key_ok, 0.0, NEG_INF)      # (S, S) f32

    # ---- LayerNorm 1 (f32 elementwise) ----
    h1 = _layernorm_f32(x, g1_ref[...], be1_ref[...], ln_eps)
    h1b = h1.astype(jnp.bfloat16)                              # bf16 MXU operand, f32 accumulate

    # ---- attention: per-head 2-D matmuls; heads live on a major weight axis, so no
    #      in-kernel lane slicing / stack / concat.  1/sqrt(dh) folded into Q weights. ----
    attn = jnp.zeros((S, D), jnp.float32)
    for h in range(H):
        q = jnp.dot(h1b, wqkv_ref[0, h], preferred_element_type=jnp.float32) + bqkv_ref[0, h]
        k = jnp.dot(h1b, wqkv_ref[1, h], preferred_element_type=jnp.float32) + bqkv_ref[1, h]
        v = jnp.dot(h1b, wqkv_ref[2, h], preferred_element_type=jnp.float32) + bqkv_ref[2, h]
        # scores q @ k^T; bias add / max / exp / sum stay f32 on every TPU generation
        s = jax.lax.dot_general(q.astype(jnp.bfloat16), k.astype(jnp.bfloat16),
                                (((1,), (1,)), ((), ())),
                                preferred_element_type=jnp.float32)       # (S, S)
        s = s + bias
        s = s - jnp.max(s, axis=-1, keepdims=True)
        p = jnp.exp(s)
        p = p * pl.reciprocal(jnp.sum(p, axis=-1, keepdims=True), approx=True)
        o_h = jnp.dot(p.astype(jnp.bfloat16), v.astype(jnp.bfloat16),
                      preferred_element_type=jnp.float32)                 # (S, dh)
        # accumulate the output projection per head (fuses head-concat into W_o)
        attn = attn + jnp.dot(o_h.astype(jnp.bfloat16), wo_ref[h],
                              preferred_element_type=jnp.float32)
    x = x + attn + bo_ref[...]

    # ---- LayerNorm 2 + MLP ----
    h2 = _layernorm_f32(x, g2_ref[...], be2_ref[...], ln_eps)
    m = jnp.dot(h2.astype(jnp.bfloat16), w1_ref[...],
                preferred_element_type=jnp.float32) + b1_ref[...]
    m = jax.nn.gelu(m)                                        # GPT-2 tanh-approx GELU, f32 on EUP
    m = jnp.dot(m.astype(jnp.bfloat16), w2_ref[...],
                preferred_element_type=jnp.float32) + b2_ref[...]
    x = x + m

    o_ref[...] = x


# ---------------------------------------------------------------------------
# Parameter init (deterministic, synthetic) -- "native" PyTorch-like layout.
# ---------------------------------------------------------------------------
def init_params(key, cfg):
    D = cfg["embedding_dim"]
    V = cfg["vocab_size"]
    C = cfg["context_length"]
    F = cfg["mlp_ratio"] * D
    L = cfg["nb_layers"]

    keys = iter(jax.random.split(key, 2 + 4 * L))
    std = 0.02

    params = {
        "tok_emb": jax.random.normal(next(keys), (V, D), jnp.float32) * std,
        "pos_emb": jax.random.normal(next(keys), (C, D), jnp.float32) * std,
        "blocks": [],
    }
    for _ in range(L):
        blk = {
            "ln1_g": jnp.ones((1, D), jnp.float32),
            "ln1_b": jnp.zeros((1, D), jnp.float32),
            "w_qkv": jax.random.normal(next(keys), (D, 3 * D), jnp.float32) * std,
            "b_qkv": jnp.zeros((1, 3 * D), jnp.float32),
            "w_o": jax.random.normal(next(keys), (D, D), jnp.float32) * std,
            "b_o": jnp.zeros((1, D), jnp.float32),
            "ln2_g": jnp.ones((1, D), jnp.float32),
            "ln2_b": jnp.zeros((1, D), jnp.float32),
            "w_fc1": jax.random.normal(next(keys), (D, F), jnp.float32) * std,
            "b_fc1": jnp.zeros((1, F), jnp.float32),
            "w_fc2": jax.random.normal(next(keys), (F, D), jnp.float32) * std,
            "b_fc2": jnp.zeros((1, D), jnp.float32),
        }
        params["blocks"].append(blk)
    return params


# ---------------------------------------------------------------------------
# Wrapper-side weight repacking: head-major Q/K/V/W_o, Q scale folded in, bf16 MXU weights.
# ---------------------------------------------------------------------------
def _stack_layer_weights(blocks, D, H, dh, scale):
    def pack(blk):
        wq, wk, wv = (blk["w_qkv"][:, i * D:(i + 1) * D] for i in range(3))
        bq, bk, bv = (blk["b_qkv"][:, i * D:(i + 1) * D] for i in range(3))
        wq = wq * scale          # fold 1/sqrt(dh) into the Q projection
        bq = bq * scale

        def w_heads(w):          # (D, D) -> (H, D, dh); head h = columns [h*dh, (h+1)*dh)
            return jnp.transpose(w.reshape(D, H, dh), (1, 0, 2))

        def b_heads(b):          # (1, D) -> (H, 1, dh)
            return jnp.transpose(b.reshape(1, H, dh), (1, 0, 2))

        return {
            "ln1_g": blk["ln1_g"], "ln1_b": blk["ln1_b"],
            "wqkv": jnp.stack([w_heads(wq), w_heads(wk), w_heads(wv)], 0).astype(jnp.bfloat16),
            "bqkv": jnp.stack([b_heads(bq), b_heads(bk), b_heads(bv)], 0).astype(jnp.float32),
            "wo": blk["w_o"].reshape(H, dh, D).astype(jnp.bfloat16),      # rows h*dh:(h+1)*dh
            "bo": blk["b_o"],
            "ln2_g": blk["ln2_g"], "ln2_b": blk["ln2_b"],
            "w1": blk["w_fc1"].astype(jnp.bfloat16), "b1": blk["b_fc1"],
            "w2": blk["w_fc2"].astype(jnp.bfloat16), "b2": blk["b_fc2"],
        }

    packed = [pack(blk) for blk in blocks]
    order = ["ln1_g", "ln1_b", "wqkv", "bqkv", "wo", "bo",
             "ln2_g", "ln2_b", "w1", "b1", "w2", "b2"]
    return [jnp.stack([p[k] for p in packed], axis=0) for k in order]


def _block_nbytes(arr):
    # bytes of one grid-step block (leading stacked axis squeezed away)
    return int(math.prod(arr.shape[1:])) * arr.dtype.itemsize


# ---------------------------------------------------------------------------
# Forward = GPTBackBone.forward (single pallas_call)
# ---------------------------------------------------------------------------
def gpt_backbone_forward(ids, params, cfg):
    B, S = ids.shape
    D = cfg["embedding_dim"]
    H = cfg["num_heads"]
    L = cfg["nb_layers"]
    F = cfg["mlp_ratio"] * D
    dh = D // H
    scale = 1.0 / float(dh) ** 0.5

    # XLA glue: data-dependent embedding gather + positional add (fused by XLA);
    # embedding dropout is identity in eval mode.
    tok = jnp.take(params["tok_emb"], ids.reshape(-1), axis=0).reshape(B, S, D)
    x0 = (tok + params["pos_emb"][:S][None, :, :]).astype(jnp.float32)          # (B, S, D)

    # tiny per-batch key-padding vector (replaces the O(M^2) HBM mask)
    keyok = (ids != cfg["pad_token"]).astype(jnp.float32).reshape(B, 1, S)      # (B, 1, S)

    weights = _stack_layer_weights(params["blocks"], D, H, dh, scale)

    # --- BlockSpecs: batch axis for activations, layer axis for weights (prefetch overlap) ---
    def batch_spec(arr):
        shp = arr.shape
        return pl.BlockSpec((None,) + shp[1:],
                            lambda b, l, _n=len(shp) - 1: (b,) + (0,) * _n)

    def layer_spec(arr):
        shp = arr.shape
        return pl.BlockSpec((None,) + shp[1:],
                            lambda b, l, _n=len(shp) - 1: (l,) + (0,) * _n)

    in_specs = [batch_spec(x0), batch_spec(keyok)] + [layer_spec(w) for w in weights]
    out_spec = pl.BlockSpec((None, S, D), lambda b, l: (b, 0, 0))

    # explicit VMEM budget: double-buffered per-step blocks + headroom for intermediates
    # (at real dims on v7x's 64 MiB this is what keeps weight streaming from OOMing)
    block_bytes = (sum(_block_nbytes(w) for w in weights)
                   + _block_nbytes(x0) + _block_nbytes(keyok) + S * D * 4)
    vmem_limit = int(min(96 * 1024 * 1024, 2 * block_bytes + (16 << 20)))

    # advisory cost estimate for XLA scheduling around the custom call
    flops_step = 8 * S * D * D + 4 * S * S * D + 4 * S * D * F
    transc_step = H * S * S + S * F + 2 * S + H * S
    bytes_accessed = (B * L * sum(_block_nbytes(w) for w in weights)
                      + 2 * B * S * D * 4 + B * S * 4)

    kernel = partial(_gpt_fused_kernel, H, cfg["ln_eps"])

    out = pl.pallas_call(
        kernel,
        out_shape=jax.ShapeDtypeStruct((B, S, D), jnp.float32),
        grid=(B, L),
        in_specs=in_specs,
        out_specs=out_spec,
        compiler_params=pltpu.CompilerParams(
            # batch blocks are independent (megacore-parallel on v7x); layers are sequential
            dimension_semantics=("parallel", "arbitrary"),
            vmem_limit_bytes=vmem_limit,
        ),
        cost_estimate=pl.CostEstimate(
            flops=int(B * L * flops_step),
            transcendentals=int(B * L * transc_step),
            bytes_accessed=int(bytes_accessed),
        ),
    )(x0, keyok, *weights)

    return out


if __name__ == "__main__":
    cfg = CONFIG
    key = jax.random.PRNGKey(0)
    k_param, k_ids = jax.random.split(key)

    params = init_params(k_param, cfg)

    B, S = 2, 8
    ids = jax.random.randint(k_ids, (B, S), 1, cfg["vocab_size"], dtype=jnp.int32)
    # force some padding positions so the attention key-mask path is exercised
    ids = ids.at[:, -2:].set(cfg["pad_token"])

    out = gpt_backbone_forward(ids, params, cfg)
    out = jax.block_until_ready(out)

    assert out.shape == (B, S, cfg["embedding_dim"])
    assert bool(jnp.all(jnp.isfinite(out)))
    print("KERNEL_OK")
</pallas_src>

<mosaic_0001>
module attributes {stable_mosaic.version = 11 : i64} {
  func.func @_gpt_fused_kernel(%arg0: i32, %arg1: i32, %arg2: memref<1x8x32xf32, #tpu.memory_space<vmem>>, %arg3: memref<1x1x8xf32, #tpu.memory_space<vmem>>, %arg4: memref<1x1x32xf32, #tpu.memory_space<vmem>>, %arg5: memref<1x1x32xf32, #tpu.memory_space<vmem>>, %arg6: memref<1x3x4x32x8xbf16, #tpu.memory_space<vmem>>, %arg7: memref<1x3x4x1x8xf32, #tpu.memory_space<vmem>>, %arg8: memref<1x4x8x32xbf16, #tpu.memory_space<vmem>>, %arg9: memref<1x1x32xf32, #tpu.memory_space<vmem>>, %arg10: memref<1x1x32xf32, #tpu.memory_space<vmem>>, %arg11: memref<1x1x32xf32, #tpu.memory_space<vmem>>, %arg12: memref<1x32x128xbf16, #tpu.memory_space<vmem>>, %arg13: memref<1x1x128xf32, #tpu.memory_space<vmem>>, %arg14: memref<1x128x32xbf16, #tpu.memory_space<vmem>>, %arg15: memref<1x1x32xf32, #tpu.memory_space<vmem>>, %arg16: memref<1x8x32xf32, #tpu.memory_space<vmem>>) attributes {dimension_semantics = [#tpu.dimension_semantics<parallel>, #tpu.dimension_semantics<arbitrary>], iteration_bounds = array<i64: 2, 2>, scalar_prefetch = 0 : i64, scratch_operands = 0 : i64, tpu.core_type = #tpu.core_type<tc>, window_params = [{transform_indices = @transform_0, window_bounds = array<i64: 1, 8, 32>}, {transform_indices = @transform_1, window_bounds = array<i64: 1, 1, 8>}, {transform_indices = @transform_2, window_bounds = array<i64: 1, 1, 32>}, {transform_indices = @transform_3, window_bounds = array<i64: 1, 1, 32>}, {transform_indices = @transform_4, window_bounds = array<i64: 1, 3, 4, 32, 8>}, {transform_indices = @transform_5, window_bounds = array<i64: 1, 3, 4, 1, 8>}, {transform_indices = @transform_6, window_bounds = array<i64: 1, 4, 8, 32>}, {transform_indices = @transform_7, window_bounds = array<i64: 1, 1, 32>}, {transform_indices = @transform_8, window_bounds = array<i64: 1, 1, 32>}, {transform_indices = @transform_9, window_bounds = array<i64: 1, 1, 32>}, {transform_indices = @transform_10, window_bounds = array<i64: 1, 32, 128>}, {transform_indices = @transform_11, window_bounds = array<i64: 1, 1, 128>}, {transform_indices = @transform_12, window_bounds = array<i64: 1, 128, 32>}, {transform_indices = @transform_13, window_bounds = array<i64: 1, 1, 32>}, {transform_indices = @transform_14, window_bounds = array<i64: 1, 8, 32>}]} {
    %c0_i32 = arith.constant 0 : i32
    %0 = arith.cmpi eq, %arg1, %c0_i32 : i32
    %1 = arith.extui %0 : i1 to i32
    %c0_i32_0 = arith.constant 0 : i32
    %2 = arith.cmpi ne, %1, %c0_i32_0 : i32
    scf.if %2 {
      %c0_220 = arith.constant 0 : index
      %c0_221 = arith.constant 0 : index
      %c0_222 = arith.constant 0 : index
      %281 = vector.load %arg2[%c0_220, %c0_221, %c0_222] : memref<1x8x32xf32, #tpu.memory_space<vmem>>, vector<1x8x32xf32>
      %282 = vector.shape_cast %281 : vector<1x8x32xf32> to vector<8x32xf32>
      %c0_223 = arith.constant 0 : index
      %c0_224 = arith.constant 0 : index
      %c0_225 = arith.constant 0 : index
      %283 = vector.load %arg16[%c0_223, %c0_224, %c0_225] : memref<1x8x32xf32, #tpu.memory_space<vmem>>, vector<1x8x32xf32>
      %284 = vector.shape_cast %283 : vector<1x8x32xf32> to vector<8x32xf32>
      %285 = vector.shape_cast %282 : vector<8x32xf32> to vector<1x8x32xf32>
      tpu.vector_store %arg16[%c0_223, %c0_224, %c0_225], %285 {strides = array<i32>} : memref<1x8x32xf32, #tpu.memory_space<vmem>>, vector<1x8x32xf32>,
    } else {
    }
    %c0 = arith.constant 0 : index
    %c0_1 = arith.constant 0 : index
    %c0_2 = arith.constant 0 : index
    %3 = vector.load %arg16[%c0, %c0_1, %c0_2] : memref<1x8x32xf32, #tpu.memory_space<vmem>>, vector<1x8x32xf32>
    %4 = vector.shape_cast %3 : vector<1x8x32xf32> to vector<8x32xf32>
    %5 = tpu.iota {dimensions = array<i32: 0>} : vector<8x8xi32>
    %6 = tpu.iota {dimensions = array<i32: 1>} : vector<8x8xi32>
    %c0_3 = arith.constant 0 : index
    %c0_4 = arith.constant 0 : index
    %c0_5 = arith.constant 0 : index
    %7 = vector.load %arg3[%c0_3, %c0_4, %c0_5] : memref<1x1x8xf32, #tpu.memory_space<vmem>>, vector<1x1x8xf32>
    %8 = vector.shape_cast %7 : vector<1x1x8xf32> to vector<1x8xf32>
    %cst = arith.constant 5.000000e-01 : f32
    %9 = vector.broadcast %cst : f32 to vector<1x8xf32>
    %10 = arith.cmpf ogt, %8, %9 : vector<1x8xf32>
    %11 = arith.cmpi sle, %6, %5 : vector<8x8xi32>
    %12 = vector.broadcast %10 : vector<1x8xi1> to vector<8x8xi1>
    %13 = arith.andi %11, %12 : vector<8x8xi1>
    %cst_6 = arith.constant 0.000000e+00 : f32
    %cst_7 = arith.constant -1.000000e+09 : f32
    %14 = vector.broadcast %cst_6 : f32 to vector<8x8xf32>
    %15 = vector.broadcast %cst_7 : f32 to vector<8x8xf32>
    %16 = arith.select %13, %14, %15 : vector<8x8xi1>, vector<8x8xf32>
    %c0_8 = arith.constant 0 : index
    %c0_9 = arith.constant 0 : index
    %c0_10 = arith.constant 0 : index
    %17 = vector.load %arg4[%c0_8, %c0_9, %c0_10] : memref<1x1x32xf32, #tpu.memory_space<vmem>>, vector<1x1x32xf32>
    %18 = vector.shape_cast %17 : vector<1x1x32xf32> to vector<1x32xf32>
    %c0_11 = arith.constant 0 : index
    %c0_12 = arith.constant 0 : index
    %c0_13 = arith.constant 0 : index
    %19 = vector.load %arg5[%c0_11, %c0_12, %c0_13] : memref<1x1x32xf32, #tpu.memory_space<vmem>>, vector<1x1x32xf32>
    %20 = vector.shape_cast %19 : vector<1x1x32xf32> to vector<1x32xf32>
    %cst_14 = arith.constant dense<0.000000e+00> : vector<8xf32>
    %21 = vector.multi_reduction <add>, %4, %cst_14 [1] : vector<8x32xf32> to vector<8xf32>
    %22 = vector.shape_cast %21 : vector<8xf32> to vector<8x1xf32>
    %cst_15 = arith.constant 3.200000e+01 : f32
    %23 = vector.broadcast %cst_15 : f32 to vector<8x1xf32>
    %24 = arith.divf %22, %23 : vector<8x1xf32>
    %25 = arith.mulf %4, %4 : vector<8x32xf32>
    %cst_16 = arith.constant dense<0.000000e+00> : vector<8xf32>
    %26 = vector.multi_reduction <add>, %25, %cst_16 [1] : vector<8x32xf32> to vector<8xf32>
    %27 = vector.shape_cast %26 : vector<8xf32> to vector<8x1xf32>
    %cst_17 = arith.constant 3.200000e+01 : f32
    %28 = vector.broadcast %cst_17 : f32 to vector<8x1xf32>
    %29 = arith.divf %27, %28 : vector<8x1xf32>
    %30 = arith.mulf %24, %24 : vector<8x1xf32>
    %31 = arith.subf %29, %30 : vector<8x1xf32>
    %32 = vector.broadcast %24 : vector<8x1xf32> to vector<8x32xf32>
    %33 = arith.subf %4, %32 : vector<8x32xf32>
    %cst_18 = arith.constant 9.99999974E-6 : f32
    %34 = vector.broadcast %cst_18 : f32 to vector<8x1xf32>
    %35 = arith.addf %31, %34 : vector<8x1xf32>
    %36 = math.rsqrt %35 : vector<8x1xf32>
    %37 = vector.broadcast %36 : vector<8x1xf32> to vector<8x32xf32>
    %38 = arith.mulf %33, %37 : vector<8x32xf32>
    %39 = vector.broadcast %18 : vector<1x32xf32> to vector<8x32xf32>
    %40 = arith.mulf %38, %39 : vector<8x32xf32>
    %41 = vector.broadcast %20 : vector<1x32xf32> to vector<8x32xf32>
    %42 = arith.addf %40, %41 : vector<8x32xf32>
    %43 = arith.truncf %42 : vector<8x32xf32> to vector<8x32xbf16>
    %cst_19 = arith.constant 0.000000e+00 : f32
    %44 = vector.broadcast %cst_19 : f32 to vector<8x32xf32>
    %c0_20 = arith.constant 0 : index
    %c0_21 = arith.constant 0 : index
    %c0_22 = arith.constant 0 : index
    %c0_23 = arith.constant 0 : index
    %c0_24 = arith.constant 0 : index
    %45 = vector.load %arg6[%c0_20, %c0_21, %c0_22, %c0_23, %c0_24] : memref<1x3x4x32x8xbf16, #tpu.memory_space<vmem>>, vector<1x1x1x32x8xbf16>
    %46 = vector.shape_cast %45 : vector<1x1x1x32x8xbf16> to vector<32x8xbf16>
    %cst_25 = arith.constant dense<0.000000e+00> : vector<8x8xf32>
    %47 = tpu.matmul %43, %46, %cst_25 {dimension_numbers = #tpu.dot_dimension_numbers<[1], [0], [0], [1], [0, 0, 1, 1], [], []>} : vector<8x32xbf16>, vector<32x8xbf16>, vector<8x8xf32> -> vector<8x8xf32>
    %c0_26 = arith.constant 0 : index
    %c0_27 = arith.constant 0 : index
    %c0_28 = arith.constant 0 : index
    %c0_29 = arith.constant 0 : index
    %c0_30 = arith.constant 0 : index
    %48 = vector.load %arg7[%c0_26, %c0_27, %c0_28, %c0_29, %c0_30] : memref<1x3x4x1x8xf32, #tpu.memory_space<vmem>>, vector<1x1x1x1x8xf32>
    %49 = vector.shape_cast %48 : vector<1x1x1x1x8xf32> to vector<1x8xf32>
    %50 = vector.broadcast %49 : vector<1x8xf32> to vector<8x8xf32>
    %51 = arith.addf %47, %50 : vector<8x8xf32>
    %c0_31 = arith.constant 0 : index
    %c1 = arith.constant 1 : index
    %c0_32 = arith.constant 0 : index
    %c0_33 = arith.constant 0 : index
    %c0_34 = arith.constant 0 : index
    %52 = vector.load %arg6[%c0_31, %c1, %c0_32, %c0_33, %c0_34] : memref<1x3x4x32x8xbf16, #tpu.memory_space<vmem>>, vector<1x1x1x32x8xbf16>
    %53 = vector.shape_cast %52 : vector<1x1x1x32x8xbf16> to vector<32x8xbf16>
    %cst_35 = arith.constant dense<0.000000e+00> : vector<8x8xf32>
    %54 = tpu.matmul %43, %53, %cst_35 {dimension_numbers = #tpu.dot_dimension_numbers<[1], [0], [0], [1], [0, 0, 1, 1], [], []>} : vector<8x32xbf16>, vector<32x8xbf16>, vector<8x8xf32> -> vector<8x8xf32>
    %c0_36 = arith.constant 0 : index
    %c1_37 = arith.constant 1 : index
    %c0_38 = arith.constant 0 : index
    %c0_39 = arith.constant 0 : index
    %c0_40 = arith.constant 0 : index
    %55 = vector.load %arg7[%c0_36, %c1_37, %c0_38, %c0_39, %c0_40] : memref<1x3x4x1x8xf32, #tpu.memory_space<vmem>>, vector<1x1x1x1x8xf32>
    %56 = vector.shape_cast %55 : vector<1x1x1x1x8xf32> to vector<1x8xf32>
    %57 = vector.broadcast %56 : vector<1x8xf32> to vector<8x8xf32>
    %58 = arith.addf %54, %57 : vector<8x8xf32>
    %c0_41 = arith.constant 0 : index
    %c2 = arith.constant 2 : index
    %c0_42 = arith.constant 0 : index
    %c0_43 = arith.constant 0 : index
    %c0_44 = arith.constant 0 : index
    %59 = vector.load %arg6[%c0_41, %c2, %c0_42, %c0_43, %c0_44] : memref<1x3x4x32x8xbf16, #tpu.memory_space<vmem>>, vector<1x1x1x32x8xbf16>
    %60 = vector.shape_cast %59 : vector<1x1x1x32x8xbf16> to vector<32x8xbf16>
    %cst_45 = arith.constant dense<0.000000e+00> : vector<8x8xf32>
    %61 = tpu.matmul %43, %60, %cst_45 {dimension_numbers = #tpu.dot_dimension_numbers<[1], [0], [0], [1], [0, 0, 1, 1], [], []>} : vector<8x32xbf16>, vector<32x8xbf16>, vector<8x8xf32> -> vector<8x8xf32>
    %c0_46 = arith.constant 0 : index
    %c2_47 = arith.constant 2 : index
    %c0_48 = arith.constant 0 : index
    %c0_49 = arith.constant 0 : index
    %c0_50 = arith.constant 0 : index
    %62 = vector.load %arg7[%c0_46, %c2_47, %c0_48, %c0_49, %c0_50] : memref<1x3x4x1x8xf32, #tpu.memory_space<vmem>>, vector<1x1x1x1x8xf32>
    %63 = vector.shape_cast %62 : vector<1x1x1x1x8xf32> to vector<1x8xf32>
    %64 = vector.broadcast %63 : vector<1x8xf32> to vector<8x8xf32>
    %65 = arith.addf %61, %64 : vector<8x8xf32>
    %66 = arith.truncf %51 : vector<8x8xf32> to vector<8x8xbf16>
    %67 = arith.truncf %58 : vector<8x8xf32> to vector<8x8xbf16>
    %cst_51 = arith.constant dense<0.000000e+00> : vector<8x8xf32>
    %68 = tpu.matmul %66, %67, %cst_51 {dimension_numbers = #tpu.dot_dimension_numbers<[1], [1], [0], [0], [0, 0, 1, 0], [], []>} : vector<8x8xbf16>, vector<8x8xbf16>, vector<8x8xf32> -> vector<8x8xf32>
    %69 = arith.addf %68, %16 : vector<8x8xf32>
    %cst_52 = arith.constant dense<0xFF800000> : vector<8xf32>
    %70 = vector.multi_reduction <maximumf>, %69, %cst_52 [1] : vector<8x8xf32> to vector<8xf32>
    %71 = vector.shape_cast %70 : vector<8xf32> to vector<8x1xf32>
    %72 = vector.broadcast %71 : vector<8x1xf32> to vector<8x8xf32>
    %73 = arith.subf %69, %72 : vector<8x8xf32>
    %74 = math.exp %73 : vector<8x8xf32>
    %cst_53 = arith.constant dense<0.000000e+00> : vector<8xf32>
    %75 = vector.multi_reduction <add>, %74, %cst_53 [1] : vector<8x8xf32> to vector<8xf32>
    %76 = vector.shape_cast %75 : vector<8xf32> to vector<8x1xf32>
    %77 = tpu.reciprocal %76 {approx = true} : vector<8x1xf32> -> vector<8x1xf32>
    %78 = vector.broadcast %77 : vector<8x1xf32> to vector<8x8xf32>
    %79 = arith.mulf %74, %78 : vector<8x8xf32>
    %80 = arith.truncf %79 : vector<8x8xf32> to vector<8x8xbf16>
    %81 = arith.truncf %65 : vector<8x8xf32> to vector<8x8xbf16>
    %cst_54 = arith.constant dense<0.000000e+00> : vector<8x8xf32>
    %82 = tpu.matmul %80, %81, %cst_54 {dimension_numbers = #tpu.dot_dimension_numbers<[1], [0], [0], [1], [0, 0, 1, 1], [], []>} : vector<8x8xbf16>, vector<8x8xbf16>, vector<8x8xf32> -> vector<8x8xf32>
    %83 = arith.truncf %82 : vector<8x8xf32> to vector<8x8xbf16>
    %c0_55 = arith.constant 0 : index
    %c0_56 = arith.constant 0 : index
    %c0_57 = arith.constant 0 : index
    %c0_58 = arith.constant 0 : index
    %84 = vector.load %arg8[%c0_55, %c0_56, %c0_57, %c0_58] : memref<1x4x8x32xbf16, #tpu.memory_space<vmem>>, vector<1x1x8x32xbf16>
    %85 = vector.shape_cast %84 : vector<1x1x8x32xbf16> to vector<8x32xbf16>
    %cst_59 = arith.constant dense<0.000000e+00> : vector<8x32xf32>
    %86 = tpu.matmul %83, %85, %cst_59 {dimension_numbers = #tpu.dot_dimension_numbers<[1], [0], [0], [1], [0, 0, 1, 1], [], []>} : vector<8x8xbf16>, vector<8x32xbf16>, vector<8x32xf32> -> vector<8x32xf32>
    %87 = arith.addf %44, %86 : vector<8x32xf32>
    %c0_60 = arith.constant 0 : index
    %c0_61 = arith.constant 0 : index
    %c1_62 = arith.constant 1 : index
    %c0_63 = arith.constant 0 : index
    %c0_64 = arith.constant 0 : index
    %88 = vector.load %arg6[%c0_60, %c0_61, %c1_62, %c0_63, %c0_64] : memref<1x3x4x32x8xbf16, #tpu.memory_space<vmem>>, vector<1x1x1x32x8xbf16>
    %89 = vector.shape_cast %88 : vector<1x1x1x32x8xbf16> to vector<32x8xbf16>
    %cst_65 = arith.constant dense<0.000000e+00> : vector<8x8xf32>
    %90 = tpu.matmul %43, %89, %cst_65 {dimension_numbers = #tpu.dot_dimension_numbers<[1], [0], [0], [1], [0, 0, 1, 1], [], []>} : vector<8x32xbf16>, vector<32x8xbf16>, vector<8x8xf32> -> vector<8x8xf32>
    %c0_66 = arith.constant 0 : index
    %c0_67 = arith.constant 0 : index
    %c1_68 = arith.constant 1 : index
    %c0_69 = arith.constant 0 : index
    %c0_70 = arith.constant 0 : index
    %91 = vector.load %arg7[%c0_66, %c0_67, %c1_68, %c0_69, %c0_70] : memref<1x3x4x1x8xf32, #tpu.memory_space<vmem>>, vector<1x1x1x1x8xf32>
    %92 = vector.shape_cast %91 : vector<1x1x1x1x8xf32> to vector<1x8xf32>
    %93 = vector.broadcast %92 : vector<1x8xf32> to vector<8x8xf32>
    %94 = arith.addf %90, %93 : vector<8x8xf32>
    %c0_71 = arith.constant 0 : index
    %c1_72 = arith.constant 1 : index
    %c1_73 = arith.constant 1 : index
    %c0_74 = arith.constant 0 : index
    %c0_75 = arith.constant 0 : index
    %95 = vector.load %arg6[%c0_71, %c1_72, %c1_73, %c0_74, %c0_75] : memref<1x3x4x32x8xbf16, #tpu.memory_space<vmem>>, vector<1x1x1x32x8xbf16>
    %96 = vector.shape_cast %95 : vector<1x1x1x32x8xbf16> to vector<32x8xbf16>
    %cst_76 = arith.constant dense<0.000000e+00> : vector<8x8xf32>
    %97 = tpu.matmul %43, %96, %cst_76 {dimension_numbers = #tpu.dot_dimension_numbers<[1], [0], [0], [1], [0, 0, 1, 1], [], []>} : vector<8x32xbf16>, vector<32x8xbf16>, vector<8x8xf32> -> vector<8x8xf32>
    %c0_77 = arith.constant 0 : index
    %c1_78 = arith.constant 1 : index
    %c1_79 = arith.constant 1 : index
    %c0_80 = arith.constant 0 : index
    %c0_81 = arith.constant 0 : index
    %98 = vector.load %arg7[%c0_77, %c1_78, %c1_79, %c0_80, %c0_81] : memref<1x3x4x1x8xf32, #tpu.memory_space<vmem>>, vector<1x1x1x1x8xf32>
    %99 = vector.shape_cast %98 : vector<1x1x1x1x8xf32> to vector<1x8xf32>
    %100 = vector.broadcast %99 : vector<1x8xf32> to vector<8x8xf32>
    %101 = arith.addf %97, %100 : vector<8x8xf32>
    %c0_82 = arith.constant 0 : index
    %c2_83 = arith.constant 2 : index
    %c1_84 = arith.constant 1 : index
    %c0_85 = arith.constant 0 : index
    %c0_86 = arith.constant 0 : index
    %102 = vector.load %arg6[%c0_82, %c2_83, %c1_84, %c0_85, %c0_86] : memref<1x3x4x32x8xbf16, #tpu.memory_space<vmem>>, vector<1x1x1x32x8xbf16>
    %103 = vector.shape_cast %102 : vector<1x1x1x32x8xbf16> to vector<32x8xbf16>
    %cst_87 = arith.constant dense<0.000000e+00> : vector<8x8xf32>
    %104 = tpu.matmul %43, %103, %cst_87 {dimension_numbers = #tpu.dot_dimension_numbers<[1], [0], [0], [1], [0, 0, 1, 1], [], []>} : vector<8x32xbf16>, vector<32x8xbf16>, vector<8x8xf32> -> vector<8x8xf32>
    %c0_88 = arith.constant 0 : index
    %c2_89 = arith.constant 2 : index
    %c1_90 = arith.constant 1 : index
    %c0_91 = arith.constant 0 : index
    %c0_92 = arith.constant 0 : index
    %105 = vector.load %arg7[%c0_88, %c2_89, %c1_90, %c0_91, %c0_92] : memref<1x3x4x1x8xf32, #tpu.memory_space<vmem>>, vector<1x1x1x1x8xf32>
    %106 = vector.shape_cast %105 : vector<1x1x1x1x8xf32> to vector<1x8xf32>
    %107 = vector.broadcast %106 : vector<1x8xf32> to vector<8x8xf32>
    %108 = arith.addf %104, %107 : vector<8x8xf32>
    %109 = arith.truncf %94 : vector<8x8xf32> to vector<8x8xbf16>
    %110 = arith.truncf %101 : vector<8x8xf32> to vector<8x8xbf16>
    %cst_93 = arith.constant dense<0.000000e+00> : vector<8x8xf32>
    %111 = tpu.matmul %109, %110, %cst_93 {dimension_numbers = #tpu.dot_dimension_numbers<[1], [1], [0], [0], [0, 0, 1, 0], [], []>} : vector<8x8xbf16>, vector<8x8xbf16>, vector<8x8xf32> -> vector<8x8xf32>
    %112 = arith.addf %111, %16 : vector<8x8xf32>
    %cst_94 = arith.constant dense<0xFF800000> : vector<8xf32>
    %113 = vector.multi_reduction <maximumf>, %112, %cst_94 [1] : vector<8x8xf32> to vector<8xf32>
    %114 = vector.shape_cast %113 : vector<8xf32> to vector<8x1xf32>
    %115 = vector.broadcast %114 : vector<8x1xf32> to vector<8x8xf32>
    %116 = arith.subf %112, %115 : vector<8x8xf32>
    %117 = math.exp %116 : vector<8x8xf32>
    %cst_95 = arith.constant dense<0.000000e+00> : vector<8xf32>
    %118 = vector.multi_reduction <add>, %117, %cst_95 [1] : vector<8x8xf32> to vector<8xf32>
    %119 = vector.shape_cast %118 : vector<8xf32> to vector<8x1xf32>
    %120 = tpu.reciprocal %119 {approx = true} : vector<8x1xf32> -> vector<8x1xf32>
    %121 = vector.broadcast %120 : vector<8x1xf32> to vector<8x8xf32>
    %122 = arith.mulf %117, %121 : vector<8x8xf32>
    %123 = arith.truncf %122 : vector<8x8xf32> to vector<8x8xbf16>
    %124 = arith.truncf %108 : vector<8x8xf32> to vector<8x8xbf16>
    %cst_96 = arith.constant dense<0.000000e+00> : vector<8x8xf32>
    %125 = tpu.matmul %123, %124, %cst_96 {dimension_numbers = #tpu.dot_dimension_numbers<[1], [0], [0], [1], [0, 0, 1, 1], [], []>} : vector<8x8xbf16>, vector<8x8xbf16>, vector<8x8xf32> -> vector<8x8xf32>
    %126 = arith.truncf %125 : vector<8x8xf32> to vector<8x8xbf16>
    %c0_97 = arith.constant 0 : index
    %c1_98 = arith.constant 1 : index
    %c0_99 = arith.constant 0 : index
    %c0_100 = arith.constant 0 : index
    %127 = vector.load %arg8[%c0_97, %c1_98, %c0_99, %c0_100] : memref<1x4x8x32xbf16, #tpu.memory_space<vmem>>, vector<1x1x8x32xbf16>
    %128 = vector.shape_cast %127 : vector<1x1x8x32xbf16> to vector<8x32xbf16>
    %cst_101 = arith.constant dense<0.000000e+00> : vector<8x32xf32>
    %129 = tpu.matmul %126, %128, %cst_101 {dimension_numbers = #tpu.dot_dimension_numbers<[1], [0], [0], [1], [0, 0, 1, 1], [], []>} : vector<8x8xbf16>, vector<8x32xbf16>, vector<8x32xf32> -> vector<8x32xf32>
    %130 = arith.addf %87, %129 : vector<8x32xf32>
    %c0_102 = arith.constant 0 : index
    %c0_103 = arith.constant 0 : index
    %c2_104 = arith.constant 2 : index
    %c0_105 = arith.constant 0 : index
    %c0_106 = arith.constant 0 : index
    %131 = vector.load %arg6[%c0_102, %c0_103, %c2_104, %c0_105, %c0_106] : memref<1x3x4x32x8xbf16, #tpu.memory_space<vmem>>, vector<1x1x1x32x8xbf16>
    %132 = vector.shape_cast %131 : vector<1x1x1x32x8xbf16> to vector<32x8xbf16>
    %cst_107 = arith.constant dense<0.000000e+00> : vector<8x8xf32>
    %133 = tpu.matmul %43, %132, %cst_107 {dimension_numbers = #tpu.dot_dimension_numbers<[1], [0], [0], [1], [0, 0, 1, 1], [], []>} : vector<8x32xbf16>, vector<32x8xbf16>, vector<8x8xf32> -> vector<8x8xf32>
    %c0_108 = arith.constant 0 : index
    %c0_109 = arith.constant 0 : index
    %c2_110 = arith.constant 2 : index
    %c0_111 = arith.constant 0 : index
    %c0_112 = arith.constant 0 : index
    %134 = vector.load %arg7[%c0_108, %c0_109, %c2_110, %c0_111, %c0_112] : memref<1x3x4x1x8xf32, #tpu.memory_space<vmem>>, vector<1x1x1x1x8xf32>
    %135 = vector.shape_cast %134 : vector<1x1x1x1x8xf32> to vector<1x8xf32>
    %136 = vector.broadcast %135 : vector<1x8xf32> to vector<8x8xf32>
    %137 = arith.addf %133, %136 : vector<8x8xf32>
    %c0_113 = arith.constant 0 : index
    %c1_114 = arith.constant 1 : index
    %c2_115 = arith.constant 2 : index
    %c0_116 = arith.constant 0 : index
    %c0_117 = arith.constant 0 : index
    %138 = vector.load %arg6[%c0_113, %c1_114, %c2_115, %c0_116, %c0_117] : memref<1x3x4x32x8xbf16, #tpu.memory_space<vmem>>, vector<1x1x1x32x8xbf16>
    %139 = vector.shape_cast %138 : vector<1x1x1x32x8xbf16> to vector<32x8xbf16>
    %cst_118 = arith.constant dense<0.000000e+00> : vector<8x8xf32>
    %140 = tpu.matmul %43, %139, %cst_118 {dimension_numbers = #tpu.dot_dimension_numbers<[1], [0], [0], [1], [0, 0, 1, 1], [], []>} : vector<8x32xbf16>, vector<32x8xbf16>, vector<8x8xf32> -> vector<8x8xf32>
    %c0_119 = arith.constant 0 : index
    %c1_120 = arith.constant 1 : index
    %c2_121 = arith.constant 2 : index
    %c0_122 = arith.constant 0 : index
    %c0_123 = arith.constant 0 : index
    %141 = vector.load %arg7[%c0_119, %c1_120, %c2_121, %c0_122, %c0_123] : memref<1x3x4x1x8xf32, #tpu.memory_space<vmem>>, vector<1x1x1x1x8xf32>
    %142 = vector.shape_cast %141 : vector<1x1x1x1x8xf32> to vector<1x8xf32>
    %143 = vector.broadcast %142 : vector<1x8xf32> to vector<8x8xf32>
    %144 = arith.addf %140, %143 : vector<8x8xf32>
    %c0_124 = arith.constant 0 : index
    %c2_125 = arith.constant 2 : index
    %c2_126 = arith.constant 2 : index
    %c0_127 = arith.constant 0 : index
    %c0_128 = arith.constant 0 : index
    %145 = vector.load %arg6[%c0_124, %c2_125, %c2_126, %c0_127, %c0_128] : memref<1x3x4x32x8xbf16, #tpu.memory_space<vmem>>, vector<1x1x1x32x8xbf16>
    %146 = vector.shape_cast %145 : vector<1x1x1x32x8xbf16> to vector<32x8xbf16>
    %cst_129 = arith.constant dense<0.000000e+00> : vector<8x8xf32>
    %147 = tpu.matmul %43, %146, %cst_129 {dimension_numbers = #tpu.dot_dimension_numbers<[1], [0], [0], [1], [0, 0, 1, 1], [], []>} : vector<8x32xbf16>, vector<32x8xbf16>, vector<8x8xf32> -> vector<8x8xf32>
    %c0_130 = arith.constant 0 : index
    %c2_131 = arith.constant 2 : index
    %c2_132 = arith.constant 2 : index
    %c0_133 = arith.constant 0 : index
    %c0_134 = arith.constant 0 : index
    %148 = vector.load %arg7[%c0_130, %c2_131, %c2_132, %c0_133, %c0_134] : memref<1x3x4x1x8xf32, #tpu.memory_space<vmem>>, vector<1x1x1x1x8xf32>
    %149 = vector.shape_cast %148 : vector<1x1x1x1x8xf32> to vector<1x8xf32>
    %150 = vector.broadcast %149 : vector<1x8xf32> to vector<8x8xf32>
    %151 = arith.addf %147, %150 : vector<8x8xf32>
    %152 = arith.truncf %137 : vector<8x8xf32> to vector<8x8xbf16>
    %153 = arith.truncf %144 : vector<8x8xf32> to vector<8x8xbf16>
    %cst_135 = arith.constant dense<0.000000e+00> : vector<8x8xf32>
    %154 = tpu.matmul %152, %153, %cst_135 {dimension_numbers = #tpu.dot_dimension_numbers<[1], [1], [0], [0], [0, 0, 1, 0], [], []>} : vector<8x8xbf16>, vector<8x8xbf16>, vector<8x8xf32> -> vector<8x8xf32>
    %155 = arith.addf %154, %16 : vector<8x8xf32>
    %cst_136 = arith.constant dense<0xFF800000> : vector<8xf32>
    %156 = vector.multi_reduction <maximumf>, %155, %cst_136 [1] : vector<8x8xf32> to vector<8xf32>
    %157 = vector.shape_cast %156 : vector<8xf32> to vector<8x1xf32>
    %158 = vector.broadcast %157 : vector<8x1xf32> to vector<8x8xf32>
    %159 = arith.subf %155, %158 : vector<8x8xf32>
    %160 = math.exp %159 : vector<8x8xf32>
    %cst_137 = arith.constant dense<0.000000e+00> : vector<8xf32>
    %161 = vector.multi_reduction <add>, %160, %cst_137 [1] : vector<8x8xf32> to vector<8xf32>
    %162 = vector.shape_cast %161 : vector<8xf32> to vector<8x1xf32>
    %163 = tpu.reciprocal %162 {approx = true} : vector<8x1xf32> -> vector<8x1xf32>
    %164 = vector.broadcast %163 : vector<8x1xf32> to vector<8x8xf32>
    %165 = arith.mulf %160, %164 : vector<8x8xf32>
    %166 = arith.truncf %165 : vector<8x8xf32> to vector<8x8xbf16>
    %167 = arith.truncf %151 : vector<8x8xf32> to vector<8x8xbf16>
    %cst_138 = arith.constant dense<0.000000e+00> : vector<8x8xf32>
    %168 = tpu.matmul %166, %167, %cst_138 {dimension_numbers = #tpu.dot_dimension_numbers<[1], [0], [0], [1], [0, 0, 1, 1], [], []>} : vector<8x8xbf16>, vector<8x8xbf16>, vector<8x8xf32> -> vector<8x8xf32>
    %169 = arith.truncf %168 : vector<8x8xf32> to vector<8x8xbf16>
    %c0_139 = arith.constant 0 : index
    %c2_140 = arith.constant 2 : index
    %c0_141 = arith.constant 0 : index
    %c0_142 = arith.constant 0 : index
    %170 = vector.load %arg8[%c0_139, %c2_140, %c0_141, %c0_142] : memref<1x4x8x32xbf16, #tpu.memory_space<vmem>>, vector<1x1x8x32xbf16>
    %171 = vector.shape_cast %170 : vector<1x1x8x32xbf16> to vector<8x32xbf16>
    %cst_143 = arith.constant dense<0.000000e+00> : vector<8x32xf32>
    %172 = tpu.matmul %169, %171, %cst_143 {dimension_numbers = #tpu.dot_dimension_numbers<[1], [0], [0], [1], [0, 0, 1, 1], [], []>} : vector<8x8xbf16>, vector<8x32xbf16>, vector<8x32xf32> -> vector<8x32xf32>
    %173 = arith.addf %130, %172 : vector<8x32xf32>
    %c0_144 = arith.constant 0 : index
    %c0_145 = arith.constant 0 : index
    %c3 = arith.constant 3 : index
    %c0_146 = arith.constant 0 : index
    %c0_147 = arith.constant 0 : index
    %174 = vector.load %arg6[%c0_144, %c0_145, %c3, %c0_146, %c0_147] : memref<1x3x4x32x8xbf16, #tpu.memory_space<vmem>>, vector<1x1x1x32x8xbf16>
    %175 = vector.shape_cast %174 : vector<1x1x1x32x8xbf16> to vector<32x8xbf16>
    %cst_148 = arith.constant dense<0.000000e+00> : vector<8x8xf32>
    %176 = tpu.matmul %43, %175, %cst_148 {dimension_numbers = #tpu.dot_dimension_numbers<[1], [0], [0], [1], [0, 0, 1, 1], [], []>} : vector<8x32xbf16>, vector<32x8xbf16>, vector<8x8xf32> -> vector<8x8xf32>
    %c0_149 = arith.constant 0 : index
    %c0_150 = arith.constant 0 : index
    %c3_151 = arith.constant 3 : index
    %c0_152 = arith.constant 0 : index
    %c0_153 = arith.constant 0 : index
    %177 = vector.load %arg7[%c0_149, %c0_150, %c3_151, %c0_152, %c0_153] : memref<1x3x4x1x8xf32, #tpu.memory_space<vmem>>, vector<1x1x1x1x8xf32>
    %178 = vector.shape_cast %177 : vector<1x1x1x1x8xf32> to vector<1x8xf32>
    %179 = vector.broadcast %178 : vector<1x8xf32> to vector<8x8xf32>
    %180 = arith.addf %176, %179 : vector<8x8xf32>
    %c0_154 = arith.constant 0 : index
    %c1_155 = arith.constant 1 : index
    %c3_156 = arith.constant 3 : index
    %c0_157 = arith.constant 0 : index
    %c0_158 = arith.constant 0 : index
    %181 = vector.load %arg6[%c0_154, %c1_155, %c3_156, %c0_157, %c0_158] : memref<1x3x4x32x8xbf16, #tpu.memory_space<vmem>>, vector<1x1x1x32x8xbf16>
    %182 = vector.shape_cast %181 : vector<1x1x1x32x8xbf16> to vector<32x8xbf16>
    %cst_159 = arith.constant dense<0.000000e+00> : vector<8x8xf32>
    %183 = tpu.matmul %43, %182, %cst_159 {dimension_numbers = #tpu.dot_dimension_numbers<[1], [0], [0], [1], [0, 0, 1, 1], [], []>} : vector<8x32xbf16>, vector<32x8xbf16>, vector<8x8xf32> -> vector<8x8xf32>
    %c0_160 = arith.constant 0 : index
    %c1_161 = arith.constant 1 : index
    %c3_162 = arith.constant 3 : index
    %c0_163 = arith.constant 0 : index
    %c0_164 = arith.constant 0 : index
    %184 = vector.load %arg7[%c0_160, %c1_161, %c3_162, %c0_163, %c0_164] : memref<1x3x4x1x8xf32, #tpu.memory_space<vmem>>, vector<1x1x1x1x8xf32>
    %185 = vector.shape_cast %184 : vector<1x1x1x1x8xf32> to vector<1x8xf32>
    %186 = vector.broadcast %185 : vector<1x8xf32> to vector<8x8xf32>
    %187 = arith.addf %183, %186 : vector<8x8xf32>
    %c0_165 = arith.constant 0 : index
    %c2_166 = arith.constant 2 : index
    %c3_167 = arith.constant 3 : index
    %c0_168 = arith.constant 0 : index
    %c0_169 = arith.constant 0 : index
    %188 = vector.load %arg6[%c0_165, %c2_166, %c3_167, %c0_168, %c0_169] : memref<1x3x4x32x8xbf16, #tpu.memory_space<vmem>>, vector<1x1x1x32x8xbf16>
    %189 = vector.shape_cast %188 : vector<1x1x1x32x8xbf16> to vector<32x8xbf16>
    %cst_170 = arith.constant dense<0.000000e+00> : vector<8x8xf32>
    %190 = tpu.matmul %43, %189, %cst_170 {dimension_numbers = #tpu.dot_dimension_numbers<[1], [0], [0], [1], [0, 0, 1, 1], [], []>} : vector<8x32xbf16>, vector<32x8xbf16>, vector<8x8xf32> -> vector<8x8xf32>
    %c0_171 = arith.constant 0 : index
    %c2_172 = arith.constant 2 : index
    %c3_173 = arith.constant 3 : index
    %c0_174 = arith.constant 0 : index
    %c0_175 = arith.constant 0 : index
    %191 = vector.load %arg7[%c0_171, %c2_172, %c3_173, %c0_174, %c0_175] : memref<1x3x4x1x8xf32, #tpu.memory_space<vmem>>, vector<1x1x1x1x8xf32>
    %192 = vector.shape_cast %191 : vector<1x1x1x1x8xf32> to vector<1x8xf32>
    %193 = vector.broadcast %192 : vector<1x8xf32> to vector<8x8xf32>
    %194 = arith.addf %190, %193 : vector<8x8xf32>
    %195 = arith.truncf %180 : vector<8x8xf32> to vector<8x8xbf16>
    %196 = arith.truncf %187 : vector<8x8xf32> to vector<8x8xbf16>
    %cst_176 = arith.constant dense<0.000000e+00> : vector<8x8xf32>
    %197 = tpu.matmul %195, %196, %cst_176 {dimension_numbers = #tpu.dot_dimension_numbers<[1], [1], [0], [0], [0, 0, 1, 0], [], []>} : vector<8x8xbf16>, vector<8x8xbf16>, vector<8x8xf32> -> vector<8x8xf32>
    %198 = arith.addf %197, %16 : vector<8x8xf32>
    %cst_177 = arith.constant dense<0xFF800000> : vector<8xf32>
    %199 = vector.multi_reduction <maximumf>, %198, %cst_177 [1] : vector<8x8xf32> to vector<8xf32>
    %200 = vector.shape_cast %199 : vector<8xf32> to vector<8x1xf32>
    %201 = vector.broadcast %200 : vector<8x1xf32> to vector<8x8xf32>
    %202 = arith.subf %198, %201 : vector<8x8xf32>
    %203 = math.exp %202 : vector<8x8xf32>
    %cst_178 = arith.constant dense<0.000000e+00> : vector<8xf32>
    %204 = vector.multi_reduction <add>, %203, %cst_178 [1] : vector<8x8xf32> to vector<8xf32>
    %205 = vector.shape_cast %204 : vector<8xf32> to vector<8x1xf32>
    %206 = tpu.reciprocal %205 {approx = true} : vector<8x1xf32> -> vector<8x1xf32>
    %207 = vector.broadcast %206 : vector<8x1xf32> to vector<8x8xf32>
    %208 = arith.mulf %203, %207 : vector<8x8xf32>
    %209 = arith.truncf %208 : vector<8x8xf32> to vector<8x8xbf16>
    %210 = arith.truncf %194 : vector<8x8xf32> to vector<8x8xbf16>
    %cst_179 = arith.constant dense<0.000000e+00> : vector<8x8xf32>
    %211 = tpu.matmul %209, %210, %cst_179 {dimension_numbers = #tpu.dot_dimension_numbers<[1], [0], [0], [1], [0, 0, 1, 1], [], []>} : vector<8x8xbf16>, vector<8x8xbf16>, vector<8x8xf32> -> vector<8x8xf32>
    %212 = arith.truncf %211 : vector<8x8xf32> to vector<8x8xbf16>
    %c0_180 = arith.constant 0 : index
    %c3_181 = arith.constant 3 : index
    %c0_182 = arith.constant 0 : index
    %c0_183 = arith.constant 0 : index
    %213 = vector.load %arg8[%c0_180, %c3_181, %c0_182, %c0_183] : memref<1x4x8x32xbf16, #tpu.memory_space<vmem>>, vector<1x1x8x32xbf16>
    %214 = vector.shape_cast %213 : vector<1x1x8x32xbf16> to vector<8x32xbf16>
    %cst_184 = arith.constant dense<0.000000e+00> : vector<8x32xf32>
    %215 = tpu.matmul %212, %214, %cst_184 {dimension_numbers = #tpu.dot_dimension_numbers<[1], [0], [0], [1], [0, 0, 1, 1], [], []>} : vector<8x8xbf16>, vector<8x32xbf16>, vector<8x32xf32> -> vector<8x32xf32>
    %216 = arith.addf %173, %215 : vector<8x32xf32>
    %217 = arith.addf %4, %216 : vector<8x32xf32>
    %c0_185 = arith.constant 0 : index
    %c0_186 = arith.constant 0 : index
    %c0_187 = arith.constant 0 : index
    %218 = vector.load %arg9[%c0_185, %c0_186, %c0_187] : memref<1x1x32xf32, #tpu.memory_space<vmem>>, vector<1x1x32xf32>
    %219 = vector.shape_cast %218 : vector<1x1x32xf32> to vector<1x32xf32>
    %220 = vector.broadcast %219 : vector<1x32xf32> to vector<8x32xf32>
    %221 = arith.addf %217, %220 : vector<8x32xf32>
    %c0_188 = arith.constant 0 : index
    %c0_189 = arith.constant 0 : index
    %c0_190 = arith.constant 0 : index
    %222 = vector.load %arg10[%c0_188, %c0_189, %c0_190] : memref<1x1x32xf32, #tpu.memory_space<vmem>>, vector<1x1x32xf32>
    %223 = vector.shape_cast %222 : vector<1x1x32xf32> to vector<1x32xf32>
    %c0_191 = arith.constant 0 : index
    %c0_192 = arith.constant 0 : index
    %c0_193 = arith.constant 0 : index
    %224 = vector.load %arg11[%c0_191, %c0_192, %c0_193] : memref<1x1x32xf32, #tpu.memory_space<vmem>>, vector<1x1x32xf32>
    %225 = vector.shape_cast %224 : vector<1x1x32xf32> to vector<1x32xf32>
    %cst_194 = arith.constant dense<0.000000e+00> : vector<8xf32>
    %226 = vector.multi_reduction <add>, %221, %cst_194 [1] : vector<8x32xf32> to vector<8xf32>
    %227 = vector.shape_cast %226 : vector<8xf32> to vector<8x1xf32>
    %cst_195 = arith.constant 3.200000e+01 : f32
    %228 = vector.broadcast %cst_195 : f32 to vector<8x1xf32>
    %229 = arith.divf %227, %228 : vector<8x1xf32>
    %230 = arith.mulf %221, %221 : vector<8x32xf32>
    %cst_196 = arith.constant dense<0.000000e+00> : vector<8xf32>
    %231 = vector.multi_reduction <add>, %230, %cst_196 [1] : vector<8x32xf32> to vector<8xf32>
    %232 = vector.shape_cast %231 : vector<8xf32> to vector<8x1xf32>
    %cst_197 = arith.constant 3.200000e+01 : f32
    %233 = vector.broadcast %cst_197 : f32 to vector<8x1xf32>
    %234 = arith.divf %232, %233 : vector<8x1xf32>
    %235 = arith.mulf %229, %229 : vector<8x1xf32>
    %236 = arith.subf %234, %235 : vector<8x1xf32>
    %237 = vector.broadcast %229 : vector<8x1xf32> to vector<8x32xf32>
    %238 = arith.subf %221, %237 : vector<8x32xf32>
    %cst_198 = arith.constant 9.99999974E-6 : f32
    %239 = vector.broadcast %cst_198 : f32 to vector<8x1xf32>
    %240 = arith.addf %236, %239 : vector<8x1xf32>
    %241 = math.rsqrt %240 : vector<8x1xf32>
    %242 = vector.broadcast %241 : vector<8x1xf32> to vector<8x32xf32>
    %243 = arith.mulf %238, %242 : vector<8x32xf32>
    %244 = vector.broadcast %223 : vector<1x32xf32> to vector<8x32xf32>
    %245 = arith.mulf %243, %244 : vector<8x32xf32>
    %246 = vector.broadcast %225 : vector<1x32xf32> to vector<8x32xf32>
    %247 = arith.addf %245, %246 : vector<8x32xf32>
    %248 = arith.truncf %247 : vector<8x32xf32> to vector<8x32xbf16>
    %c0_199 = arith.constant 0 : index
    %c0_200 = arith.constant 0 : index
    %c0_201 = arith.constant 0 : index
    %249 = vector.load %arg12[%c0_199, %c0_200, %c0_201] : memref<1x32x128xbf16, #tpu.memory_space<vmem>>, vector<1x32x128xbf16>
    %250 = vector.shape_cast %249 : vector<1x32x128xbf16> to vector<32x128xbf16>
    %cst_202 = arith.constant dense<0.000000e+00> : vector<8x128xf32>
    %251 = tpu.matmul %248, %250, %cst_202 {dimension_numbers = #tpu.dot_dimension_numbers<[1], [0], [0], [1], [0, 0, 1, 1], [], []>} : vector<8x32xbf16>, vector<32x128xbf16>, vector<8x128xf32> -> vector<8x128xf32>
    %c0_203 = arith.constant 0 : index
    %c0_204 = arith.constant 0 : index
    %c0_205 = arith.constant 0 : index
    %252 = vector.load %arg13[%c0_203, %c0_204, %c0_205] : memref<1x1x128xf32, #tpu.memory_space<vmem>>, vector<1x1x128xf32>
    %253 = vector.shape_cast %252 : vector<1x1x128xf32> to vector<1x128xf32>
    %254 = vector.broadcast %253 : vector<1x128xf32> to vector<8x128xf32>
    %255 = arith.addf %251, %254 : vector<8x128xf32>
    %256 = arith.mulf %255, %255 : vector<8x128xf32>
    %257 = arith.mulf %255, %256 : vector<8x128xf32>
    %cst_206 = arith.constant 4.471500e-02 : f32
    %258 = vector.broadcast %cst_206 : f32 to vector<8x128xf32>
    %259 = arith.mulf %258, %257 : vector<8x128xf32>
    %260 = arith.addf %255, %259 : vector<8x128xf32>
    %cst_207 = arith.constant 0.797884583 : f32
    %261 = vector.broadcast %cst_207 : f32 to vector<8x128xf32>
    %262 = arith.mulf %261, %260 : vector<8x128xf32>
    %263 = math.tanh %262 : vector<8x128xf32>
    %cst_208 = arith.constant 1.000000e+00 : f32
    %264 = vector.broadcast %cst_208 : f32 to vector<8x128xf32>
    %265 = arith.addf %264, %263 : vector<8x128xf32>
    %cst_209 = arith.constant 5.000000e-01 : f32
    %266 = vector.broadcast %cst_209 : f32 to vector<8x128xf32>
    %267 = arith.mulf %266, %265 : vector<8x128xf32>
    %268 = arith.mulf %255, %267 : vector<8x128xf32>
    %269 = arith.truncf %268 : vector<8x128xf32> to vector<8x128xbf16>
    %c0_210 = arith.constant 0 : index
    %c0_211 = arith.constant 0 : index
    %c0_212 = arith.constant 0 : index
    %270 = vector.load %arg14[%c0_210, %c0_211, %c0_212] : memref<1x128x32xbf16, #tpu.memory_space<vmem>>, vector<1x128x32xbf16>
    %271 = vector.shape_cast %270 : vector<1x128x32xbf16> to vector<128x32xbf16>
    %cst_213 = arith.constant dense<0.000000e+00> : vector<8x32xf32>
    %272 = tpu.matmul %269, %271, %cst_213 {dimension_numbers = #tpu.dot_dimension_numbers<[1], [0], [0], [1], [0, 0, 1, 1], [], []>} : vector<8x128xbf16>, vector<128x32xbf16>, vector<8x32xf32> -> vector<8x32xf32>
    %c0_214 = arith.constant 0 : index
    %c0_215 = arith.constant 0 : index
    %c0_216 = arith.constant 0 : index
    %273 = vector.load %arg15[%c0_214, %c0_215, %c0_216] : memref<1x1x32xf32, #tpu.memory_space<vmem>>, vector<1x1x32xf32>
    %274 = vector.shape_cast %273 : vector<1x1x32xf32> to vector<1x32xf32>
    %275 = vector.broadcast %274 : vector<1x32xf32> to vector<8x32xf32>
    %276 = arith.addf %272, %275 : vector<8x32xf32>
    %277 = arith.addf %221, %276 : vector<8x32xf32>
    %c0_217 = arith.constant 0 : index
    %c0_218 = arith.constant 0 : index
    %c0_219 = arith.constant 0 : index
    %278 = vector.load %arg16[%c0_217, %c0_218, %c0_219] : memref<1x8x32xf32, #tpu.memory_space<vmem>>, vector<1x8x32xf32>
    %279 = vector.shape_cast %278 : vector<1x8x32xf32> to vector<8x32xf32>
    %280 = vector.shape_cast %277 : vector<8x32xf32> to vector<1x8x32xf32>
    tpu.vector_store %arg16[%c0_217, %c0_218, %c0_219], %280 {strides = array<i32>} : memref<1x8x32xf32, #tpu.memory_space<vmem>>, vector<1x8x32xf32>,
    return
  }
  func.func @transform_0(%arg0: i32, %arg1: i32) -> (i32, i32, i32) {
    %c0_i32 = arith.constant 0 : i32
    %c0_i32_0 = arith.constant 0 : i32
    %c0_i32_1 = arith.constant 0 : i32
    return %arg0, %c0_i32, %c0_i32_0 : i32, i32, i32
  }
  func.func @transform_1(%arg0: i32, %arg1: i32) -> (i32, i32, i32) {
    %c0_i32 = arith.constant 0 : i32
    %c0_i32_0 = arith.constant 0 : i32
    %c0_i32_1 = arith.constant 0 : i32
    return %arg0, %c0_i32, %c0_i32_0 : i32, i32, i32
  }
  func.func @transform_2(%arg0: i32, %arg1: i32) -> (i32, i32, i32) {
    %c0_i32 = arith.constant 0 : i32
    %c0_i32_0 = arith.constant 0 : i32
    %c0_i32_1 = arith.constant 0 : i32
    return %arg1, %c0_i32, %c0_i32_0 : i32, i32, i32
  }
  func.func @transform_3(%arg0: i32, %arg1: i32) -> (i32, i32, i32) {
    %c0_i32 = arith.constant 0 : i32
    %c0_i32_0 = arith.constant 0 : i32
    %c0_i32_1 = arith.constant 0 : i32
    return %arg1, %c0_i32, %c0_i32_0 : i32, i32, i32
  }
  func.func @transform_4(%arg0: i32, %arg1: i32) -> (i32, i32, i32, i32, i32) {
    %c0_i32 = arith.constant 0 : i32
    %c0_i32_0 = arith.constant 0 : i32
    %c0_i32_1 = arith.constant 0 : i32
    %c0_i32_2 = arith.constant 0 : i32
    %c0_i32_3 = arith.constant 0 : i32
    return %arg1, %c0_i32, %c0_i32_0, %c0_i32_1, %c0_i32_2 : i32, i32, i32, i32, i32
  }
  func.func @transform_5(%arg0: i32, %arg1: i32) -> (i32, i32, i32, i32, i32) {
    %c0_i32 = arith.constant 0 : i32
    %c0_i32_0 = arith.constant 0 : i32
    %c0_i32_1 = arith.constant 0 : i32
    %c0_i32_2 = arith.constant 0 : i32
    %c0_i32_3 = arith.constant 0 : i32
    return %arg1, %c0_i32, %c0_i32_0, %c0_i32_1, %c0_i32_2 : i32, i32, i32, i32, i32
  }
  func.func @transform_6(%arg0: i32, %arg1: i32) -> (i32, i32, i32, i32) {
    %c0_i32 = arith.constant 0 : i32
    %c0_i32_0 = arith.constant 0 : i32
    %c0_i32_1 = arith.constant 0 : i32
    %c0_i32_2 = arith.constant 0 : i32
    return %arg1, %c0_i32, %c0_i32_0, %c0_i32_1 : i32, i32, i32, i32
  }
  func.func @transform_7(%arg0: i32, %arg1: i32) -> (i32, i32, i32) {
    %c0_i32 = arith.constant 0 : i32
    %c0_i32_0 = arith.constant 0 : i32
    %c0_i32_1 = arith.constant 0 : i32
    return %arg1, %c0_i32, %c0_i32_0 : i32, i32, i32
  }
  func.func @transform_8(%arg0: i32, %arg1: i32) -> (i32, i32, i32) {
    %c0_i32 = arith.constant 0 : i32
    %c0_i32_0 = arith.constant 0 : i32
    %c0_i32_1 = arith.constant 0 : i32
    return %arg1, %c0_i32, %c0_i32_0 : i32, i32, i32
  }
  func.func @transform_9(%arg0: i32, %arg1: i32) -> (i32, i32, i32) {
    %c0_i32 = arith.constant 0 : i32
    %c0_i32_0 = arith.constant 0 : i32
    %c0_i32_1 = arith.constant 0 : i32
    return %arg1, %c0_i32, %c0_i32_0 : i32, i32, i32
  }
  func.func @transform_10(%arg0: i32, %arg1: i32) -> (i32, i32, i32) {
    %c0_i32 = arith.constant 0 : i32
    %c0_i32_0 = arith.constant 0 : i32
    %c0_i32_1 = arith.constant 0 : i32
    return %arg1, %c0_i32, %c0_i32_0 : i32, i32, i32
  }
  func.func @transform_11(%arg0: i32, %arg1: i32) -> (i32, i32, i32) {
    %c0_i32 = arith.constant 0 : i32
    %c0_i32_0 = arith.constant 0 : i32
    %c0_i32_1 = arith.constant 0 : i32
    return %arg1, %c0_i32, %c0_i32_0 : i32, i32, i32
  }
  func.func @transform_12(%arg0: i32, %arg1: i32) -> (i32, i32, i32) {
    %c0_i32 = arith.constant 0 : i32
    %c0_i32_0 = arith.constant 0 : i32
    %c0_i32_1 = arith.constant 0 : i32
    return %arg1, %c0_i32, %c0_i32_0 : i32, i32, i32
  }
  func.func @transform_13(%arg0: i32, %arg1: i32) -> (i32, i32, i32) {
    %c0_i32 = arith.constant 0 : i32
    %c0_i32_0 = arith.constant 0 : i32
    %c0_i32_1 = arith.constant 0 : i32
    return %arg1, %c0_i32, %c0_i32_0 : i32, i32, i32
  }
  func.func @transform_14(%arg0: i32, %arg1: i32) -> (i32, i32, i32) {
    %c0_i32 = arith.constant 0 : i32
    %c0_i32_0 = arith.constant 0 : i32
    %c0_i32_1 = arith.constant 0 : i32
    return %arg0, %c0_i32, %c0_i32_0 : i32, i32, i32
  }
}

</mosaic_0001>

<bundles_post_ra>
// kernel: tpu_custom_call.1
= control target key start
LH: loop header
LB: loop body
LE: loop exit
PB: predicated region body
PF: predicated region fallthrough
CT: control target
= control target key end

     0   :  { %s2810_s0 = inlined_call_operand.vmem [shape: f32[2,8,32], index: 0, kind: input, shape index: {}]   ;;  %s2811_s1 = inlined_call_operand.vmem [shape: f32[2,1,8], index: 1, kind: input, shape index: {}]   ;;  %s2812_s2 = inlined_call_operand.vmem [shape: f32[2,1,32], index: 2, kind: input, shape index: {}]   ;;  %s2813_s3 = inlined_call_operand.vmem [shape: f32[2,1,32], index: 3, kind: input, shape index: {}]   ;;  %s2814_s4 = inlined_call_operand.vmem [shape: bf16[2,3,4,32,8], index: 4, kind: input, shape index: {}]   ;;  %s2815_s5 = inlined_call_operand.vmem [shape: f32[2,3,4,1,8], index: 5, kind: input, shape index: {}]   ;;  %s2816_s6 = inlined_call_operand.vmem [shape: bf16[2,4,8,32], index: 6, kind: input, shape index: {}]   ;;  %s2817_s7 = inlined_call_operand.vmem [shape: f32[2,1,32], index: 7, kind: input, shape index: {}]   ;;  %s2818_s8 = inlined_call_operand.vmem [shape: f32[2,1,32], index: 8, kind: input, shape index: {}]   ;;  %s2819_s9 = inlined_call_operand.vmem [shape: f32[2,1,32], index: 9, kind: input, shape index: {}]   ;;  %s2820_s10 = inlined_call_operand.vmem [shape: bf16[2,32,128], index: 10, kind: input, shape index: {}]   ;;  %s2821_s11 = inlined_call_operand.vmem [shape: f32[2,1,128], index: 11, kind: input, shape index: {}]   ;;  %s2822_s12 = inlined_call_operand.vmem [shape: bf16[2,128,32], index: 12, kind: input, shape index: {}]   ;;  %s2823_s13 = inlined_call_operand.vmem [shape: f32[2,1,32], index: 13, kind: input, shape index: {}]   ;;  %s2824_s14 = inlined_call_operand.hbm [shape: f32[2,8,32], index: 14, kind: output, shape index: {}]  }
   0x1   :  { %2841 = sst [smem:[#allocation19_spill]] %s2810_s0 }
   0x2   :  { %2842 = sst [smem:[#allocation20_spill]] %s2814_s4 }
   0x3   :  { %2843 = sst [smem:[#allocation21_spill]] %s2815_s5 }
   0x4   :  { %2844 = sst [smem:[#allocation22_spill]] %s2816_s6 }
   0x5   :  { %2845 = sst [smem:[#allocation23_spill]] %s2817_s7 }
   0x6   :  { %2846 = sst [smem:[#allocation24_spill]] %s2818_s8 }
   0x7   :  { %2847 = sst [smem:[#allocation25_spill]] %s2821_s11 }
   0x8   :  { %2848 = sst [smem:[#allocation26_spill]] %s2822_s12 }
   0x9   :  { %2849 = sst [smem:[#allocation27_spill]] %s2823_s13 }
   0xa   :  { %2850 = sst [smem:[#allocation28_spill]] %s2824_s14 }
   0xb   :  { %19 = vsyncpa [#allocation3], 0 }
   0xc   :  { %21 = vsyncpa [#allocation3 + $0x1], 0  ;;  %s2428_s29 = smov 0   ;;  %s2430_s30 = smov 0  }
   0xd   :  { %s2432_s15 = smov 0   ;;  %s2434_s16 = smov 0  }
   0xe   :  { %s2436_s17 = smov 0   ;;  %s2438_s18 = smov 0  }
   0xf   :  { %s2440_s19 = smov 0   ;;  %s2442_s20 = smov 0  }
  0x10 LB: > { %2851 = sst [smem:[#allocation5_spill]] %s2320_s29  ;;  %s1860_s21 = sadd.s32 4294967295, %s2348_s20   ;;  %s2348_s20 = sphi %s2442_s20, %s27_s20   ;;  %s2344_s19 = sphi %s2440_s19, %s2902_s19   ;;  %s2340_s18 = sphi %s2438_s18, %s2901_s18   ;;  %s2336_s17 = sphi %s2436_s17, %s2900_s17   ;;  %s2332_s16 = sphi %s2434_s16, %s2899_s16   ;;  %s2328_s15 = sphi %s2432_s15, %s2898_s15   ;;  %s2324_s30 = sphi %s2430_s30, %s2897_s30   ;;  %s2320_s29 = sphi %s2428_s29, %s2896_s29  }
  0x11   : > { %2852 = sst [smem:[#allocation6_spill]] %s2324_s30  ;;  %s1861_s22 = sadd.s32 4294967294, %s2348_s20  }
  0x12   : > { %2853 = sst [smem:[#allocation7_spill]] %s2328_s15  ;;  %s36_s23 = sadd.s32 1, %s2340_s18 }
  0x13   : > { %2854 = sst [smem:[#allocation8_spill]] %s2332_s16  ;;  %p37_p0 = scmp.ge.s32.totalorder %s36_s23, 2 }
  0x14   : > { %2855 = sst [smem:[#allocation9_spill]] %s2336_s17  ;;  %s39_s24 = sadd.s32 1, %s2344_s19 }
  0x15   : > { %2856 = sst [smem:[#allocation10_spill]] %s2340_s18  ;;  %p420_p1 = scmp.ne.s32.totalorder %s2328_s15, %s2324_s30 }
  0x16   : > { %2857 = sst [smem:[#allocation11_spill]] %s2344_s19  ;;  %p421_p2 = scmp.eq.s32.totalorder %s1860_s21, 3 }
  0x17   : > { %2858 = sst [smem:[#allocation12_spill]] %s2348_s20  ;;  %s2904_s23 = smov (%p37_p0, %s36_s23), 0 }
  0x18   : > { %2859 = sst [smem:[#allocation13_spill]] %s2904_s23  ;;  %s2906_s24 = smov (!%p37_p0, %s39_s24), %s2344_s19 }
  0x19   : > { %p2477_p3 = por %p421_p2, %p420_p1  ;;  %p426_p4 = scmp.ne.s32.totalorder %s2324_s30, %s2320_s29 }
  0x1a   : > { %p41_p5 = scmp.ge.s32.totalorder %s2906_s24, 2  ;;  %p427_p6 = scmp.eq.s32.totalorder %s1861_s22, 3 }
  0x1b   : > { %s2860_s25 = scalar_select %p2477_p3, 1, 0 }
  0x1c   : > { %p1864_p7 = scmp.ge.s32.totalorder %s2348_s20, 1  ;;  %p539_p8 = scmp.lt.s32.totalorder %s2348_s20, 5 }
  0x1d   : > { %2861 = sst [smem:[#allocation14_spill]] %s2860_s25  ;;  %s2908_s24 = smov (%p41_p5, %s2906_s24), 0 }
  0x1e   : > { %2862 = sst [smem:[#allocation15_spill]] %s2908_s24  ;;  %p2487_p9 = por %p427_p6, %p426_p4 }
  0x1f   : > { %p540_p10 = pnand %p1864_p7, %p539_p8  ;;  %s407_s27 = ssub.s32 %s2344_s19, %s2908_s24 }
  0x20   : > { %s2863_s26 = scalar_select %p2487_p9, 1, 0 }
  0x21   : > { %s410_s28 = sadd.s32 1, %s2328_s15  ;;  %p408_p11 = scmp.eq.s32.totalorder %s407_s27, 0 }
  0x22   : > { %2864 = sst [smem:[#allocation16_spill]] %s2863_s26  ;;  %543 = sbr.rel (%p540_p10) target bundleno = 2951 (0xb87), region = 76 }
  0x23   : > { %s2495_s21 = scalar_select %p408_p11, %s2328_s15, %s410_s28  }
  0x25   : > { %2865 = sst [smem:[#allocation17_spill]] %s2495_s21 }
  0x27   : > { %s2828_s22 = sand.u32 1, %s2324_s30   ;;  %p632_p12 = scmp.lt.s32.totalorder %s2336_s17, 1 }
  0x28   : > { %s1865_s23 = sshll.u32 %s2828_s22, 3  ;;  %p639_p13 = scmp.lt.s32.totalorder %s2332_s16, 1 }
  0x29   : > { %s2503_s18 = scalar_select %p632_p12, %s2336_s17, 1 }
  0x2a   : > { %s2506_s24 = scalar_select %p639_p13, %s2332_s16, 1 }
  0x2b   : > { %s1866_s27 = sshll.u32 %s2503_s18, 3  ;;  %s2866_s0 = sld [smem:[#allocation19_spill]] }
  0x2c   : > { %s2135_s16 = smul.u32 192, %s2506_s24  ;;  %s2098_s13 = sshll.u32 %s2506_s24, 4 }
  0x2d   : > { %s2136_s12 = smul.u32 12, %s2506_s24  ;;  %s2867_s4 = sld [smem:[#allocation20_spill]] }
  0x2e   : > { %s2868_s6 = sld [smem:[#allocation22_spill]] }
  0x2f   : > { %s2870_s5 = sld [smem:[#allocation21_spill]] }
  0x30   : > { %s2873_s29 = sld [smem:[#allocation25_spill]] }
  0x31   : > { %s635_s26 = scalar_lea.vmem %s2866_s0, %s1866_s27  ;;  %s2874_s17 = sld [smem:[#allocation27_spill]] }
  0x32   : > { %s2875_s11 = sld [smem:[#allocation26_spill]] }
  0x33   : > { %s2530_s28 = scalar_lea.vmem %s2867_s4, %s2135_s16  ;;  %s667_s4 = scalar_lea.vmem %s2819_s9, %s2506_s24 }
  0x34   : > { %s2535_s21 = scalar_lea.vmem %s2868_s6, %s2098_s13  ;;  %s2557_s6 = scalar_lea.vmem %s2820_s10, %s2098_s13 }
  0x35   : > { %2869 = sst [smem:[#allocation18_spill]] %s2535_s21  ;;  %s2540_s20 = scalar_lea.vmem %s2870_s5, %s2136_s12 }
  0x36   : > { %s675_s5 = scalar_lea.vmem %s2873_s29, %s2506_s24  ;;  %s2100_s21 = sshll.u32 %s2506_s24, 6 }
  0x37   : > { %s683_s7 = scalar_lea.vmem %s2874_s17, %s2506_s24  ;;  %s2573_s16 = scalar_lea.vmem [#allocation2], %s1865_s23 }
  0x38   : > { %s2571_s8 = scalar_lea.vmem %s2875_s11, %s2100_s21  ;;  %s2876_s19 = sld [smem:[#allocation8_spill]] }
  0x3e   : > { %p1874_p0 = scmp.ne.s32.totalorder %s2876_s19, 0 }
  0x40   : > { %688 = sbr.rel (%p1874_p0) target bundleno = 71 (0x47), region = 80 }
  0x45   : > { %v689_v0 = vld [vmem:[%s635_s26] sm:$0xff]  ;;  %vm690_vm0 = vcmask 261120  }
  0x46   : > { %691 = vst.msk [vmem:[%s2573_s16] sm:$0xff] %vm690_vm0, %v689_v0 }
  0x47 PF: > { %vm707_vm1 = vcmask 261120   ;;  %v2350_v5 = vmov 32.0   ;;  %v2102_v12 = vld [vmem:[%s2530_s28 + $0x8] sm:$0xff]  ;;  %v2108_v14 = vld [vmem:[%s2530_s28 + $0x18] sm:$0xff]  ;;  %v2101_v16 = vld [vmem:[%s2530_s28] sm:$0xff]  ;;  %s2877_s23 = scalar_lea.vmem %s2812_s2, %s2506_s24  ;;  %s2878_s11 = scalar_lea.vmem %s2813_s3, %s2506_s24  ;;  %vm856_vm6 = vcmask 64512  }
  0x48   : > { %2230 = vrcp.f32 %v2350_v5  ;;  %v2104_v13 = vld [vmem:[%s2530_s28 + $0x48] sm:$0xff]  ;;  %777 = vmatpush.bf16.msra.mxu0 %v2102_v12  ;;  %939 = vmatpush.bf16.msra.mxu1 %v2108_v14  ;;  %v2103_v17 = vld [vmem:[%s2530_s28 + $0x40] sm:$0xff]  ;;  %v2107_v18 = vld [vmem:[%s2530_s28 + $0x10] sm:$0xff]  ;;  %vm892_vm7 = vcmask 1043456   ;;  %s2879_s27 = scalar_lea.vmem %s2811_s1, %s2503_s18  ;;  %v2352_v14 = vmov -1e+09  }
  0x49   : > { %812 = vmatpush.bf16.msra.mxu2 %v2104_v13  ;;  %v2106_v23 = vld [vmem:[%s2530_s28 + $0x88] sm:$0xff]  ;;  %v2105_v25 = vld [vmem:[%s2530_s28 + $0x80] sm:$0xff]  ;;  %v2110_v40 = vld [vmem:[%s2530_s28 + $0x58] sm:$0xff]  ;;  %s2880_s18 = sld [smem:[#allocation18_spill]] }
  0x4a   : > { %v2211_v34 = vld [vmem:[%s2877_s23] ss:$0 sm:$0xff]  ;;  %v2109_v42 = vld [vmem:[%s2530_s28 + $0x50] sm:$0xff]  ;;  %v2215_v45 = vld [vmem:[%s2540_s20 + $0x4] ss:$0 sm:$0xff]  ;;  %s2881_s12 = sld [smem:[#allocation23_spill]] }
  0x4b   : > { %v2212_v36 = vld [vmem:[%s2878_s11] ss:$0 sm:$0xff]  ;;  %v2112_v52 = vld [vmem:[%s2530_s28 + $0x98] sm:$0xff]  ;;  %v2111_v55 = vld [vmem:[%s2530_s28 + $0x90] sm:$0xff]  ;;  %s2883_s25 = sld [smem:[#allocation24_spill]] }
  0x4c   : > { %778 = vmatpush.bf16.msra.mxu0 %v2101_v16  ;;  %940 = vmatpush.bf16.msra.mxu1 %v2107_v18  ;;  %v2213_v49 = vld [vmem:[%s2540_s20] ss:$0 sm:$0xff]  ;;  %v2216_v58 = vld [vmem:[%s2540_s20 + $0x8] ss:$0 sm:$0xff]  ;;  %v2217_v0 = vld [vmem:[%s2540_s20 + $0x5] ss:$0 sm:$0xff] }
  0x4d   : > { %v2578_v1 = vld [vmem:[%s2573_s16] sm:$0xff]  ;;  %813 = vmatpush.bf16.msra.mxu2 %v2103_v17  ;;  %s2886_s23 = sld [smem:[#allocation9_spill]] }
  0x4e   : > { %v708_v2 = vsel %vm707_vm1, %v2578_v1, 0.0  ;;  %v719_v3 = vmul.f32 %v2578_v1, %v2578_v1  ;;  %v2231_v6 = vpop.eup %2230 }
  0x4f   : > { %709 = vadd.xlane.f32.xlu0 %v708_v2  ;;  %v712_v7 = vmul.f32 32.0, %v2231_v6  ;;  %vm716_vm2 = vweird.f32 %v2231_v6 }
  0x50   : > { %v720_v4 = vsel %vm707_vm1, %v719_v3, 0.0  ;;  %s2882_s29 = scalar_lea.vmem %s2881_s12, %s2506_s24  ;;  %s1655_s12 = sshll.u32 %s2573_s16, 4  ;;  %s1656_s12 = int_to_ptr.vmem [resolvable:$true] %s1655_s12 }
  0x51   : > { %v713_v8 = vsub.f32 1.0, %v712_v7  ;;  %847 = vmatpush.bf16.msrb.mxu2 %v2106_v23  ;;  %v697_v7 = vld [vmem:[%s2879_s27] sm:$0x1]  ;;  %s2884_s0 = scalar_lea.vmem %s2883_s25, %s2506_s24 }
  0x52   : > { %vm698_vm8 = vcmp.gt.f32.partialorder %v697_v7, 0.5 }
  0x53   : > { %v714_v9 = vmul.f32 %v2231_v6, %v713_v8  ;;  %v693_v8 = vlaneseq }
  0x55   : > { %v715_v10 = vadd.f32 %v2231_v6, %v714_v9  ;;  %848 = vmatpush.bf16.msrb.mxu2 %v2105_v25  ;;  %v2351_v9 = vmov 0   ;;  %v696_v12 = vand.u32 127, %v693_v8 }
  0x57   : > { %721 = vadd.xlane.f32.xlu0 %v720_v4  ;;  %v2588_v15 = vsel %vm716_vm2, %v2231_v6, %v715_v10  ;;  %v700_v10 = vsel %vm698_vm8, 1, %v2351_v9 }
  0x58   : > { %v701_v13 = vperm.slane %v700_v10, 0  ;;  %v2119_v10 = vld [vmem:[%s2530_s28 + $0x30] sm:$0xff] }
  0x5a   : > { %vm702_vm10 = vcmp.eq.s32.totalorder %v701_v13, 1 }
  0xc2   : > { %v710_v11 = vpop.xlane.xlu0 %709 }
  0xc3   : > { %v718_v19 = vmul.f32 %v2588_v15, %v710_v11  ;;  %v694_v11 = vshrl.u32 %v693_v8, 7  ;;  %v2120_v8 = vld [vmem:[%s2530_s28 + $0x38] sm:$0xff] }
  0xc5   : > { %v724_v21 = vmul.f32 %v718_v19, %v718_v19  ;;  %v726_v33 = vsub.f32 %v2578_v1, %v718_v19  ;;  %vm699_vm9 = vcmp.le.s32.totalorder %v696_v12, %v694_v11  ;;  %v2220_v12 = vld [vmem:[%s2540_s20 + $0x6] ss:$0 sm:$0xff] }
  0xc6   : > { %vm703_vm11 = vmand %vm699_vm9, %vm702_vm10 }
  0xc7   : > { %v2641_v16 = vsel %vm703_vm11, 0.0, %v2352_v14 }
  0xca   : > { %v722_v20 = vpop.xlane.xlu0 %721 }
  0xcb   : > { %v723_v22 = vmul.f32 %v722_v20, %v2588_v15 }
  0xcd   : > { %v725_v24 = vsub.f32 %v723_v22, %v724_v21  ;;  %v2218_v21 = vld [vmem:[%s2540_s20 + $0x9] ss:$0 sm:$0xff] }
  0xcf   : > { %v727_v26 = vadd.f32 1e-05, %v725_v24 }
  0xd1   : > { %2232 = vrsqrt.f32 %v727_v26  ;;  %vm734_vm4 = vweird.f32 %v727_v26 }
  0xd7   : > { %v2233_v27 = vpop.eup %2232 }
  0xd8   : > { %v729_v28 = vmul.f32 %v2233_v27, %v727_v26  ;;  %vm735_vm3 = vweird.f32 %v2233_v27 }
  0xd9   : > { %vm736_vm5 = vmor %vm734_vm4, %vm735_vm3 }
  0xda   : > { %v730_v29 = vmul.f32 %v2233_v27, %v729_v28 }
  0xdc   : > { %v731_v30 = vmul.f32 0.5, %v730_v29 }
  0xde   : > { %v732_v31 = vsub.f32 1.5, %v731_v30 }
  0xe0   : > { %v733_v32 = vmul.f32 %v2233_v27, %v732_v31 }
  0xe2   : > { %v737_v35 = vsel %vm736_vm5, %v2233_v27, %v733_v32 }
  0xe3   : > { %v738_v37 = vmul.f32 %v737_v35, %v726_v33  ;;  %v2114_v35 = vld [vmem:[%s2530_s28 + $0x28] sm:$0xff] }
  0xe5   : > { %v742_v38 = vmul.f32 %v2211_v34, %v738_v37  ;;  %v2113_v37 = vld [vmem:[%s2530_s28 + $0x20] sm:$0xff] }
  0xe7   : > { %v746_v39 = vadd.f32 %v2212_v36, %v742_v38  ;;  %v2214_v38 = vld [vmem:[%s2540_s20 + $0x1] ss:$0 sm:$0xff] }
  0xe9   : > { %v2609_v41 = vpack.c.bf16 %v746_v39, %v746_v39 }
  0xeb   : > { %1883 = vmatmul.msk.bf16.vlgmr.msra.gmra.mxu0 %vm707_vm1, %v2609_v41  ;;  %1897 = vmatmul.msk.bf16.vlgmr.msra.gmra.mxu2 %vm707_vm1, %v2609_v41 }
  0xec   : > { %1927 = vmatmul.msk.bf16.vlgmr.msra.gmra.mxu1 %vm707_vm1, %v2609_v41  ;;  %974 = vmatpush.bf16.msra.mxu2 %v2110_v40 }
  0xf0   : > { %975 = vmatpush.bf16.msra.mxu2 %v2109_v42  ;;  %v910_v42 = vld [vmem:[%s2880_s18] sm:$0xf] }
  0xfb   : > { %1911 = vmatmul.msk.bf16.vlgmr.msrb.gmra.mxu2 %vm707_vm1, %v2609_v41 }
 0x10b   : > { %1941 = vmatmul.msk.bf16.vlgmr.msra.gmra.mxu2 %vm707_vm1, %v2609_v41 }
 0x168   : > { %v780_v43 = vpop.f32.mrf.mxu0 }
 0x169   : > { %v2622_v44 = vpop.f32.mrf.mxu1  ;;  %v781_v54 = vadd.f32 %v2213_v49, %v780_v43  ;;  %v1095_v43 = vsel %vm892_vm7, %v910_v42, 0 }
 0x16a   : > { %v943_v39 = vadd.f32 %v2214_v38, %v2622_v44 }
 0x16b   : > { %v854_v57 = vpack.c.bf16 %v781_v54, %v781_v54 }
 0x16c   : > { %v1016_v40 = vpack.c.bf16 %v943_v39, %v943_v39 }
 0x16e   : > { %v815_v46 = vpop.f32.mrf.mxu2 }
 0x16f   : > { %v816_v47 = vadd.f32 %v2215_v45, %v815_v46 }
 0x170   : > { %v782_v48 = vpop.f32.mrf.mxu0 }
 0x171   : > { %v855_v50 = vpack.c.bf16 %v816_v47, %v816_v47  ;;  %v944_v51 = vpop.f32.mrf.mxu1 }
 0x173   : > { %v861_v53 = vsel %vm856_vm6, %v855_v50, 0 }
 0x174   : > { %870 = vmatpush.bf16.xpose.msra.mxu3 %v861_v53 }
 0x176   : > { %v817_v56 = vpop.f32.mrf.mxu2 }
 0x17b   : > { %1912 = vmatmul.msk.bf16.vlgmr.msra.gmra.mxu3 %vm856_vm6, %v854_v57 }
 0x17c   : > { %1009 = vmatpush.bf16.msrb.mxu3 %v2112_v52 }
 0x17e   : > { %v850_v59 = vpop.f32.mrf.mxu2 }
 0x17f   : > { %v851_v60 = vadd.f32 %v2216_v58, %v850_v59 }
 0x180   : > { %1010 = vmatpush.bf16.msrb.mxu3 %v2111_v55 }
 0x181   : > { %v888_v61 = vpack.c.bf16 %v851_v60, %v851_v60  ;;  %v2116_v60 = vld [vmem:[%s2530_s28 + $0x68] sm:$0xff] }
 0x183   : > { %v894_v62 = vsel %vm892_vm7, %v888_v61, 0  ;;  %v2115_v61 = vld [vmem:[%s2530_s28 + $0x60] sm:$0xff] }
 0x184   : > { %903 = vmatpush.bf16.msrb.mxu0 %v894_v62  ;;  %1104 = vmatpush.bf16.msra.mxu3 %v1095_v43 }
 0x186   : > { %v852_v63 = vpop.f32.mrf.mxu2 }
 0x18b   : > { %1955 = vmatmul.msk.bf16.vlgmr.msrb.gmra.mxu3 %vm707_vm1, %v2609_v41 }
 0x18e   : > { %v977_v2 = vpop.f32.mrf.mxu2 }
 0x18f   : > { %v978_v3 = vadd.f32 %v2217_v0, %v977_v2 }
 0x191   : > { %v1017_v4 = vpack.c.bf16 %v978_v3, %v978_v3  ;;  %v1958_v3 = vld [vmem:[%s2880_s18 + $0x4] sm:$0xf] }
 0x193   : > { %v1022_v5 = vsel %vm856_vm6, %v1017_v4, 0  ;;  %v1076_v4 = vsel %vm892_vm7, %v1958_v3, 0 }
 0x194   : > { %1031 = vmatpush.bf16.xpose.msra.mxu0 %v1022_v5  ;;  %1085 = vmatpush.bf16.msrb.mxu2 %v1076_v4  ;;  %v2118_v5 = vld [vmem:[%s2530_s28 + $0xa8] sm:$0xff] }
 0x196   : > { %v979_v6 = vpop.f32.mrf.mxu2 }
 0x197   : > { %v2117_v6 = vld [vmem:[%s2530_s28 + $0xa0] sm:$0xff] }
 0x198   : > { %1208 = vmatpush.bf16.msra.mxu2 %v2118_v5 }
 0x19c   : > { %1209 = vmatpush.bf16.msra.mxu2 %v2117_v6 }
 0x1fe   : > { %v872_v17 = vpop.f32.mrf.mxu3 }
 0x1ff   : > { %v873_v18 = vadd.f32 %v872_v17, %v2641_v16  ;;  %v2219_v17 = vld [vmem:[%s2540_s20 + $0x2] ss:$0 sm:$0xff] }
 0x201   : > { %v876_v19 = vsel %vm856_vm6, %v873_v18, -inf }
 0x202   : > { %877 = vmax.xlane.f32.xlu1 %v876_v19  ;;  %v2122_v19 = vld [vmem:[%s2530_s28 + $0x78] sm:$0xff] }
 0x206   : > { %v874_v20 = vpop.f32.mrf.mxu3 }
 0x20e   : > { %v1012_v22 = vpop.f32.mrf.mxu3 }
 0x20f   : > { %v1013_v23 = vadd.f32 %v2218_v21, %v1012_v22  ;;  %v2121_v22 = vld [vmem:[%s2530_s28 + $0x70] sm:$0xff] }
 0x211   : > { %v1049_v24 = vpack.c.bf16 %v1013_v23, %v1013_v23 }
 0x213   : > { %v1054_v25 = vsel %vm892_vm7, %v1049_v24, 0 }
 0x214   : > { %1063 = vmatpush.bf16.msrb.mxu1 %v1054_v25 }
 0x216   : > { %v1014_v26 = vpop.f32.mrf.mxu3 }
 0x218   : > { %1173 = vmatpush.bf16.msra.mxu1 %v2116_v60 }
 0x21c   : > { %1174 = vmatpush.bf16.msra.mxu1 %v2115_v61 }
 0x275   : > { %v878_v27 = vpop.xlane.xlu1 %877 }
 0x276   : > { %v879_v28 = vsub.f32 %v873_v18, %v878_v27  ;;  %v2221_v27 = vld [vmem:[%s2540_s20 + $0xa] ss:$0 sm:$0xff] }
 0x278   : > { %v880_v29 = vmul.f32 1.442695, %v879_v28  ;;  %v2005_v28 = vld [vmem:[%s2880_s18 + $0x8] sm:$0xf] }
 0x27a   : > { %2234 = vpow2.f32 %v880_v29  ;;  %v1275_v29 = vsel %vm892_vm7, %v2005_v28, 0 }
 0x280   : > { %v2235_v30 = vpop.eup %2234 }
 0x281   : > { %v882_v31 = vsel %vm856_vm6, %v2235_v30, 0.0 }
 0x282   : > { %883 = vadd.xlane.f32.xlu1 %v882_v31 }
 0x2f5   : > { %v884_v32 = vpop.xlane.xlu1 %883 }
 0x2f6   : > { %2236 = vrcp.f32 %v884_v32 }
 0x2fc   : > { %v2237_v33 = vpop.eup %2236 }
 0x2fd   : > { %v886_v34 = vmul.f32 %v2237_v33, %v2235_v30 }
 0x2ff   : > { %v887_v36 = vpack.c.bf16 %v886_v34, %v886_v34 }
 0x301   : > { %1913 = vmatmul.msk.bf16.vlgmr.msrb.gmra.mxu0 %vm856_vm6, %v887_v36 }
 0x302   : > { %1138 = vmatpush.bf16.msrb.mxu0 %v2114_v35 }
 0x306   : > { %1139 = vmatpush.bf16.msrb.mxu0 %v2113_v37 }
 0x311   : > { %1956 = vmatmul.msk.bf16.vlgmr.msra.gmra.mxu0 %vm856_vm6, %v1016_v40  ;;  %v2223_v40 = vld [vmem:[%s2540_s20 + $0x7] ss:$0 sm:$0xff] }
 0x321   : > { %1974 = vmatmul.msk.bf16.vlgmr.msrb.gmra.mxu0 %vm707_vm1, %v2609_v41 }
 0x37e   : > { %v905_v45 = vpop.f32.mrf.mxu0 }
 0x37f   : > { %v909_v46 = vpack.c.bf16 %v905_v45, %v905_v45 }
 0x381   : > { %1960 = vmatmul.msk.bf16.vlgmr.msra.gmra.mxu3 %vm856_vm6, %v909_v46 }
 0x386   : > { %v907_v47 = vpop.f32.mrf.mxu0 }
 0x38e   : > { %v1033_v48 = vpop.f32.mrf.mxu0 }
 0x38f   : > { %v1034_v49 = vadd.f32 %v1033_v48, %v2641_v16 }
 0x391   : > { %v1037_v44 = vsel %vm856_vm6, %v1034_v49, -inf }
 0x392   : > { %1038 = vmax.xlane.f32.xlu2 %v1037_v44 }
 0x396   : > { %v1035_v50 = vpop.f32.mrf.mxu0 }
 0x39e   : > { %v1141_v51 = vpop.f32.mrf.mxu0 }
 0x39f   : > { %v1142_v21 = vadd.f32 %v2219_v17, %v1141_v51 }
 0x3a1   : > { %v1215_v24 = vpack.c.bf16 %v1142_v21, %v1142_v21 }
 0x3a6   : > { %v1143_v52 = vpop.f32.mrf.mxu0 }
 0x404   : > { %v2661_v53 = vpop.f32.mrf.mxu3 }
 0x405   : > { %v1039_v54 = vpop.xlane.xlu2 %1038 }
 0x406   : > { %v1040_v55 = vsub.f32 %v1034_v49, %v1039_v54  ;;  %v2124_v54 = vld [vmem:[%s2530_s28 + $0xb8] sm:$0xff] }
 0x408   : > { %v1041_v56 = vmul.f32 1.442695, %v1040_v55  ;;  %v2123_v55 = vld [vmem:[%s2530_s28 + $0xb0] sm:$0xff] }
 0x40a   : > { %2238 = vpow2.f32 %v1041_v56 }
 0x40c   : > { %v1108_v57 = vpop.f32.mrf.mxu3 }
 0x410   : > { %v2239_v58 = vpop.eup %2238 }
 0x411   : > { %v1043_v59 = vsel %vm856_vm6, %v2239_v58, 0.0 }
 0x412   : > { %1044 = vadd.xlane.f32.xlu2 %v1043_v59 }
 0x485   : > { %v1045_v62 = vpop.xlane.xlu2 %1044 }
 0x486   : > { %2240 = vrcp.f32 %v1045_v62 }
 0x48c   : > { %v2241_v63 = vpop.eup %2240 }
 0x48d   : > { %v1047_v0 = vmul.f32 %v2241_v63, %v2239_v58  ;;  %v2222_v63 = vld [vmem:[%s2540_s20 + $0x3] ss:$0 sm:$0xff] }
 0x48f   : > { %v1048_v2 = vpack.c.bf16 %v1047_v0, %v1047_v0 }
 0x491   : > { %1957 = vmatmul.msk.bf16.vlgmr.msrb.gmra.mxu1 %vm856_vm6, %v1048_v2  ;;  %v2224_v2 = vld [vmem:[%s2540_s20 + $0xb] ss:$0 sm:$0xff] }
 0x492   : > { %1284 = vmatpush.bf16.msrb.mxu1 %v1275_v29 }
 0x4a1   : > { %1988 = vmatmul.msk.bf16.vlgmr.msra.gmra.mxu1 %vm707_vm1, %v2609_v41 }
 0x50e   : > { %v1065_v7 = vpop.f32.mrf.mxu1 }
 0x50f   : > { %v1069_v9 = vpack.c.bf16 %v1065_v7, %v1065_v7 }
 0x511   : > { %1959 = vmatmul.msk.bf16.vlgmr.msrb.gmra.mxu2 %vm856_vm6, %v1069_v9 }
 0x512   : > { %1319 = vmatpush.bf16.msrb.mxu2 %v2120_v8 }
 0x516   : > { %v1067_v11 = vpop.f32.mrf.mxu1  ;;  %1320 = vmatpush.bf16.msrb.mxu2 %v2119_v10 }
 0x51e   : > { %v1176_v13 = vpop.f32.mrf.mxu1 }
 0x51f   : > { %v1177_v14 = vadd.f32 %v2220_v12, %v1176_v13 }
 0x521   : > { %v1216_v18 = vpack.c.bf16 %v1177_v14, %v1177_v14  ;;  %2002 = vmatmul.msk.bf16.vlgmr.msra.gmra.mxu2 %vm707_vm1, %v2609_v41 }
 0x523   : > { %v1221_v20 = vsel %vm856_vm6, %v1216_v18, 0 }
 0x524   : > { %1230 = vmatpush.bf16.xpose.msrb.mxu3 %v1221_v20 }
 0x526   : > { %v1178_v23 = vpop.f32.mrf.mxu1 }
 0x52b   : > { %2003 = vmatmul.msk.bf16.vlgmr.msrb.gmra.mxu3 %vm856_vm6, %v1215_v24 }
 0x52c   : > { %1354 = vmatpush.bf16.msra.mxu3 %v2122_v19 }
 0x530   : > { %1355 = vmatpush.bf16.msra.mxu3 %v2121_v22 }
 0x531   : > { %2020 = vmatmul.msk.bf16.vlgmr.msrb.gmra.mxu2 %vm707_vm1, %v2609_v41 }
 0x53b   : > { %2034 = vmatmul.msk.bf16.vlgmr.msra.gmra.mxu3 %vm707_vm1, %v2609_v41 }
 0x594   : > { %v1087_v25 = vpop.f32.mrf.mxu2 }
 0x59c   : > { %v1089_v26 = vpop.f32.mrf.mxu2 }
 0x5a4   : > { %v1211_v30 = vpop.f32.mrf.mxu2 }
 0x5a5   : > { %v1212_v31 = vadd.f32 %v2221_v27, %v1211_v30 }
 0x5a7   : > { %v1248_v32 = vpack.c.bf16 %v1212_v31, %v1212_v31 }
 0x5a9   : > { %v1253_v33 = vsel %vm892_vm7, %v1248_v32, 0  ;;  %v2225_v32 = vld [vmem:[%s2882_s29] ss:$0 sm:$0xff] }
 0x5aa   : > { %1262 = vmatpush.bf16.msra.mxu0 %v1253_v33 }
 0x5ac   : > { %v1213_v34 = vpop.f32.mrf.mxu2 }
 0x5ae   : > { %v1232_v35 = vpop.f32.mrf.mxu3  ;;  %1389 = vmatpush.bf16.msrb.mxu0 %v2124_v54 }
 0x5af   : > { %v1233_v36 = vadd.f32 %v1232_v35, %v2641_v16 }
 0x5b1   : > { %v1236_v37 = vsel %vm856_vm6, %v1233_v36, -inf }
 0x5b2   : > { %1237 = vmax.xlane.f32.xlu0 %v1236_v37  ;;  %1390 = vmatpush.bf16.msrb.mxu0 %v2123_v55 }
 0x5b4   : > { %v1322_v38 = vpop.f32.mrf.mxu2 }
 0x5b5   : > { %v1323_v0 = vadd.f32 %v2222_v63, %v1322_v38  ;;  %v2133_v63 = vld [vmem:[%s2571_s8 + $0x30] sm:$0xff] }
 0x5b6   : > { %v1234_v39 = vpop.f32.mrf.mxu3 }
 0x5b7   : > { %v1396_v4 = vpack.c.bf16 %v1323_v0, %v1323_v0  ;;  %v2126_v39 = vld [vmem:[%s2557_s6 + $0x8] sm:$0xff] }
 0x5b8   : > { %v2132_v0 = vld [vmem:[%s2571_s8 + $0x28] sm:$0xff] }
 0x5bc   : > { %v1324_v42 = vpop.f32.mrf.mxu2 }
 0x5be   : > { %v1357_v43 = vpop.f32.mrf.mxu3 }
 0x5bf   : > { %v1358_v45 = vadd.f32 %v2223_v40, %v1357_v43  ;;  %v2125_v40 = vld [vmem:[%s2557_s6] sm:$0xff] }
 0x5c1   : > { %v1397_v46 = vpack.c.bf16 %v1358_v45, %v1358_v45 }
 0x5c3   : > { %v1402_v47 = vsel %vm856_vm6, %v1397_v46, 0 }
 0x5c4   : > { %1411 = vmatpush.bf16.xpose.msra.mxu1 %v1402_v47  ;;  %v2134_v47 = vld [vmem:[%s2571_s8 + $0x38] sm:$0xff] }
 0x5c6   : > { %v1359_v48 = vpop.f32.mrf.mxu3 }
 0x625   : > { %v1238_v49 = vpop.xlane.xlu0 %1237 }
 0x626   : > { %v1239_v44 = vsub.f32 %v1233_v36, %v1238_v49 }
 0x628   : > { %v1240_v50 = vmul.f32 1.442695, %v1239_v44 }
 0x62a   : > { %2242 = vpow2.f32 %v1240_v50 }
 0x630   : > { %v2243_v51 = vpop.eup %2242 }
 0x631   : > { %v1242_v52 = vsel %vm856_vm6, %v2243_v51, 0.0 }
 0x632   : > { %1243 = vadd.xlane.f32.xlu1 %v1242_v52 }
 0x6a5   : > { %v1244_v56 = vpop.xlane.xlu1 %1243 }
 0x6a6   : > { %2244 = vrcp.f32 %v1244_v56 }
 0x6ac   : > { %v2245_v57 = vpop.eup %2244 }
 0x6ad   : > { %v1246_v58 = vmul.f32 %v2245_v57, %v2243_v51 }
 0x6af   : > { %v1247_v59 = vpack.c.bf16 %v1246_v58, %v1246_v58 }
 0x6b1   : > { %2004 = vmatmul.msk.bf16.vlgmr.msra.gmra.mxu0 %vm856_vm6, %v1247_v59  ;;  %v2227_v59 = vld [vmem:[%s667_s4] ss:$0 sm:$0xff] }
 0x6b2   : > { %1542 = vmatpush.bf16.msra.mxu0 %v2126_v39 }
 0x6b6   : > { %1543 = vmatpush.bf16.msra.mxu0 %v2125_v40 }
 0x6c1   : > { %2048 = vmatmul.msk.bf16.vlgmr.msrb.gmra.mxu0 %vm707_vm1, %v2609_v41  ;;  %v1107_v41 = vadd.f32 %v2661_v53, %v1087_v25  ;;  %v2051_v53 = vld [vmem:[%s2880_s18 + $0xc] sm:$0xf]  ;;  %s2890_s18 = sld [smem:[#allocation28_spill]] }
 0x6c2   : > { %v1456_v23 = vsel %vm892_vm7, %v2051_v53, 0 }
 0x6c3   : > { %1465 = vmatpush.bf16.msrb.mxu3 %v1456_v23 }
 0x6c7   : > { %s2891_s28 = smov %s2890_s18 }
 0x6c8   : > { %s2274_s14 = scalar_lea.hbm %s2891_s28, 16 }
 0x72e   : > { %v1264_v60 = vpop.f32.mrf.mxu0 }
 0x72f   : > { %v1268_v61 = vpack.c.bf16 %v1264_v60, %v1264_v60 }
 0x731   : > { %2006 = vmatmul.msk.bf16.vlgmr.msrb.gmra.mxu1 %vm856_vm6, %v1268_v61 }
 0x732   : > { %1627 = vmatpush.bf16.msrb.mxu1 %v2134_v47 }
 0x736   : > { %v1266_v62 = vpop.f32.mrf.mxu0  ;;  %1628 = vmatpush.bf16.msrb.mxu1 %v2133_v63 }
 0x73a   : > { %1629 = vmatpush.bf16.msrb.mxu1 %v2132_v0 }
 0x73e   : > { %v1392_v3 = vpop.f32.mrf.mxu0 }
 0x73f   : > { %v1393_v5 = vadd.f32 %v2224_v2, %v1392_v3  ;;  %v2131_v2 = vld [vmem:[%s2571_s8 + $0x20] sm:$0xff]  ;;  %v2130_v3 = vld [vmem:[%s2571_s8 + $0x18] sm:$0xff] }
 0x740   : > { %1630 = vmatpush.bf16.msrb.mxu1 %v2131_v2 }
 0x741   : > { %v1429_v6 = vpack.c.bf16 %v1393_v5, %v1393_v5  ;;  %2049 = vmatmul.msk.bf16.vlgmr.msra.gmra.mxu1 %vm856_vm6, %v1396_v4  ;;  %v2129_v4 = vld [vmem:[%s2571_s8 + $0x10] sm:$0xff]  ;;  %v2128_v5 = vld [vmem:[%s2571_s8 + $0x8] sm:$0xff] }
 0x743   : > { %v1434_v7 = vsel %vm892_vm7, %v1429_v6, 0  ;;  %v2127_v6 = vld [vmem:[%s2571_s8] sm:$0xff]  ;;  %s2887_s8 = sld [smem:[#allocation6_spill]] }
 0x744   : > { %1443 = vmatpush.bf16.msra.mxu2 %v1434_v7  ;;  %1631 = vmatpush.bf16.msrb.mxu1 %v2130_v3  ;;  %v2228_v7 = vld [vmem:[%s675_s5] ss:$0 sm:$0xff]  ;;  %s2095_s5 = sshll.u32 %s2886_s23, 3 }
 0x745   : > { %s1653_s20 = scalar_lea.hbm %s2890_s18, %s2095_s5 }
 0x746   : > { %v1394_v8 = vpop.f32.mrf.mxu0  ;;  %s1657_s29 = sshll.u32 %s1653_s20, 4  ;;  %s1658_s29 = int_to_ptr.hbm [resolvable:$true] %s1657_s29 }
 0x747   : > { %s2268_s25 = sshra.s32 %s1658_s29, 4  ;;  %s2269_s25 = int_to_ptr.hbm [resolvable:$true] %s2268_s25 }
 0x748   : > { %1632 = vmatpush.bf16.msrb.mxu1 %v2129_v4  ;;  %s2270_s24 = scalar_lea.hbm %s2269_s25, 8  ;;  %p2275_p5 = scmp.lt.s32.totalorder %s2269_s25, %s2891_s28 }
 0x749   : > { %s2892_s6 = sand.u32 1, %s2887_s8   ;;  %p2271_p1 = scmp.ne.s32.totalorder %s2269_s25, %s2270_s24 }
 0x74a   : > { %s1643_s30 = scalar_lea.sflag [#allocation3], %s2892_s6  ;;  %p2276_p6 = scmp.lt.s32.totalorder %s2274_s14, %s2270_s24 }
 0x74b   : > { %p2272_p2 = pnand %p2271_p1, %p2477_p3 }
 0x74c   : > { %1633 = vmatpush.bf16.msrb.mxu1 %v2128_v5  ;;  %p2277_p7 = por %p2276_p6, %p2275_p5 }
 0x74d   : > { %p2273_p4 = pneg %p2272_p2 }
 0x74f   : > { %p2278_p8 = pnand %p2277_p7, %p2273_p4 }
 0x750   : > { %1634 = vmatpush.bf16.msrb.mxu1 %v2127_v6 }
 0x7ae   : > { %v1286_v9 = vpop.f32.mrf.mxu1 }
 0x7af   : > { %v1290_v10 = vadd.f32 %v1286_v9, %v1107_v41 }
 0x7b6   : > { %v1288_v11 = vpop.f32.mrf.mxu1 }
 0x7be   : > { %v1413_v12 = vpop.f32.mrf.mxu1 }
 0x7bf   : > { %v1414_v13 = vadd.f32 %v1413_v12, %v2641_v16 }
 0x7c1   : > { %v1417_v14 = vsel %vm856_vm6, %v1414_v13, -inf }
 0x7c2   : > { %1418 = vmax.xlane.f32.xlu2 %v1417_v14 }
 0x7c6   : > { %v1415_v17 = vpop.f32.mrf.mxu1 }
 0x835   : > { %v1419_v18 = vpop.xlane.xlu2 %1418 }
 0x836   : > { %v1420_v19 = vsub.f32 %v1414_v13, %v1419_v18 }
 0x838   : > { %v1421_v20 = vmul.f32 1.442695, %v1420_v19 }
 0x83a   : > { %2246 = vpow2.f32 %v1421_v20 }
 0x840   : > { %v2247_v21 = vpop.eup %2246 }
 0x841   : > { %v1423_v22 = vsel %vm856_vm6, %v2247_v21, 0.0 }
 0x842   : > { %1424 = vadd.xlane.f32.xlu0 %v1423_v22  ;;  %v2229_v22 = vld [vmem:[%s683_s7] ss:$0 sm:$0xff] }
 0x8b5   : > { %v1425_v24 = vpop.xlane.xlu0 %1424 }
 0x8b6   : > { %2248 = vrcp.f32 %v1425_v24 }
 0x8bc   : > { %v2249_v16 = vpop.eup %2248 }
 0x8bd   : > { %v1427_v25 = vmul.f32 %v2249_v16, %v2247_v21 }
 0x8bf   : > { %v1428_v26 = vpack.c.bf16 %v1427_v25, %v1427_v25 }
 0x8c1   : > { %2050 = vmatmul.msk.bf16.vlgmr.msra.gmra.mxu2 %vm856_vm6, %v1428_v26 }
 0x944   : > { %v1445_v27 = vpop.f32.mrf.mxu2 }
 0x945   : > { %v1449_v28 = vpack.c.bf16 %v1445_v27, %v1445_v27 }
 0x947   : > { %2052 = vmatmul.msk.bf16.vlgmr.msrb.gmra.mxu3 %vm856_vm6, %v1449_v28 }
 0x94c   : > { %v1447_v29 = vpop.f32.mrf.mxu2 }
 0x9ca   : > { %v1467_v30 = vpop.f32.mrf.mxu3 }
 0x9cb   : > { %v1471_v31 = vadd.f32 %v1467_v30, %v1290_v10 }
 0x9cd   : > { %v1472_v33 = vadd.f32 %v1471_v31, %v2578_v1 }
 0x9cf   : > { %v2721_v34 = vadd.f32 %v2225_v32, %v1472_v33 }
 0x9d1   : > { %v1480_v35 = vsel %vm707_vm1, %v2721_v34, 0.0  ;;  %v1484_v36 = vmul.f32 %v2721_v34, %v2721_v34 }
 0x9d2   : > { %1481 = vadd.xlane.f32.xlu1 %v1480_v35  ;;  %v1469_v37 = vpop.f32.mrf.mxu3 }
 0x9d3   : > { %v1485_v38 = vsel %vm707_vm1, %v1484_v36, 0.0 }
 0x9d4   : > { %1486 = vadd.xlane.f32.xlu2 %v1485_v38 }
 0xa45   : > { %v1482_v42 = vpop.xlane.xlu1 %1481 }
 0xa46   : > { %v1483_v1 = vmul.f32 %v1482_v42, %v2588_v15 }
 0xa47   : > { %v1487_v43 = vpop.xlane.xlu2 %1486 }
 0xa48   : > { %v1489_v45 = vmul.f32 %v1483_v1, %v1483_v1  ;;  %v1488_v46 = vmul.f32 %v1487_v43, %v2588_v15  ;;  %v1491_v56 = vsub.f32 %v2721_v34, %v1483_v1  ;;  %v2226_v15 = vld [vmem:[%s2884_s0] ss:$0 sm:$0xff] }
 0xa4a   : > { %v1490_v48 = vsub.f32 %v1488_v46, %v1489_v45 }
 0xa4c   : > { %v1492_v49 = vadd.f32 1e-05, %v1490_v48 }
 0xa4e   : > { %2250 = vrsqrt.f32 %v1492_v49  ;;  %vm1499_vm13 = vweird.f32 %v1492_v49 }
 0xa54   : > { %v2251_v44 = vpop.eup %2250 }
 0xa55   : > { %v1494_v50 = vmul.f32 %v2251_v44, %v1492_v49  ;;  %vm1500_vm12 = vweird.f32 %v2251_v44 }
 0xa56   : > { %vm1501_vm14 = vmor %vm1499_vm13, %vm1500_vm12 }
 0xa57   : > { %v1495_v51 = vmul.f32 %v2251_v44, %v1494_v50 }
 0xa59   : > { %v1496_v52 = vmul.f32 0.5, %v1495_v51 }
 0xa5b   : > { %v1497_v54 = vsub.f32 1.5, %v1496_v52 }
 0xa5d   : > { %v1498_v55 = vmul.f32 %v2251_v44, %v1497_v54 }
 0xa5f   : > { %v1502_v57 = vsel %vm1501_vm14, %v2251_v44, %v1498_v55 }
 0xa60   : > { %v1503_v58 = vmul.f32 %v1502_v57, %v1491_v56 }
 0xa62   : > { %v1507_v60 = vmul.f32 %v2226_v15, %v1503_v58 }
 0xa64   : > { %v1511_v61 = vadd.f32 %v2227_v59, %v1507_v60 }
 0xa66   : > { %v1512_v62 = vpack.c.bf16 %v1511_v61, %v1511_v61 }
 0xa68   : > { %2061 = vmatmul.msk.bf16.vlgmr.msra.gmra.mxu0 %vm707_vm1, %v1512_v62 }
 0xae5   : > { %v1545_v8 = vpop.f32.mrf.mxu0 }
 0xae6   : > { %v1546_v41 = vadd.f32 %v2228_v7, %v1545_v8 }
 0xae8   : > { %v1549_v9 = vmul.f32 %v1546_v41, %v1546_v41 }
 0xaea   : > { %v1550_v10 = vmul.f32 %v1549_v9, %v1546_v41 }
 0xaec   : > { %v1551_v11 = vmul.f32 0.044715, %v1550_v10 }
 0xaed   : > { %v1547_v12 = vpop.f32.mrf.mxu0 }
 0xaee   : > { %v1552_v13 = vadd.f32 %v1551_v11, %v1546_v41 }
 0xaf0   : > { %v1553_v14 = vmul.f32 0.7978846, %v1552_v13 }
 0xaf2   : > { %2252 = vtanh.f32 %v1553_v14 }
 0xaf8   : > { %v2253_v17 = vpop.eup %2252 }
 0xaf9   : > { %v1555_v18 = vadd.f32 1.0, %v2253_v17 }
 0xafb   : > { %v1556_v19 = vmul.f32 0.5, %v1555_v18 }
 0xafd   : > { %v1557_v20 = vmul.f32 %v1556_v19, %v1546_v41 }
 0xaff   : > { %v1558_v21 = vpack.c.bf16 %v1557_v20, %v1557_v20 }
 0xb01   : > { %1635 = vmatmul.bf16.vlgmr.msrb.gmra.mxu1 %v1558_v21 }
 0xb7e   : > { %v1636_v53 = vpop.f32.mrf.mxu1 }
 0xb7f   : > { %v1637_v23 = vadd.f32 %v2229_v22, %v1636_v53 }
 0xb81   : > { %v1640_v24 = vadd.f32 %v1637_v23, %v2721_v34 }
 0xb83   : > { %1641 = vst.msk [vmem:[%s2573_s16] sm:$0xff] %vm707_vm1, %v1640_v24 }
 0xb84   : > { %2281 = shalt.err (!%p2278_p8)
}
 0xb85   : > { %2137 = dma.vmem_to_hbm [thread:$0]  (%p2477_p3), %s1656_s12, 128, %s1658_s29, %s1643_s30  }
 0xb86   : > { %v1638_v16 = vpop.f32.mrf.mxu1 }
 0xb87 PF: > { %s2893_s16 = sld [smem:[#allocation12_spill]] }
 0xb88   : > { %s2894_s13 = sld [smem:[#allocation5_spill]] }
 0xb8d   : > { %p2143_p10 = scmp.ge.s32.totalorder %s2893_s16, 2 }
 0xb8e   : > { %s1669_s23 = sand.u32 1, %s2894_s13  }
 0xb8f   : > { %p2140_p11 = pnand %p2143_p10, %p2487_p9  ;;  %s1670_s8 = scalar_lea.sflag [#allocation3], %s1669_s23 }
 0xb91   : > { %p2141_p12 = pneg %p2140_p11 }
 0xb93   : > { %2315 = dma.done.wait (%p2141_p12), %s1670_s8, 128  }
 0xb94   : > { %2317 = vsyncadd (%p2141_p12), %s1670_s8, 4294967168  ;;  %s27_s20 = sadd.s32 1, %s2893_s16   ;;  %s2896_s29 = sld [smem:[#allocation6_spill]] }
 0xb95   : > { %p24_p13 = scmp.ge.s32.totalorder %s27_s20, 6   ;;  %s2897_s30 = sld [smem:[#allocation7_spill]] }
 0xb96   : > { %s2898_s15 = sld [smem:[#allocation17_spill]] }
 0xb97   : > { %s2899_s16 = sld [smem:[#allocation10_spill]]  ;;  %26 = sbr.rel (!%p24_p13) target bundleno = 16 (0x10), region = 179 }
 0xb98   : > { %s2900_s17 = sld [smem:[#allocation11_spill]] }
 0xb99   : > { %s2901_s18 = sld [smem:[#allocation13_spill]] }
 0xb9a   : > { %s2902_s19 = sld [smem:[#allocation15_spill]] }
 0xb9c   :  { %1676 = vsyncpa [#allocation3], 1 }
 0xb9d   :  { %1678 = vsyncpa [#allocation3 + $0x1], 1 }

</bundles_post_ra>
